<compile_context>
chip_gen: v5e
topology: v5e:2x2
jax: 0.10.0
libtpu: 0.0.40
codegen_flags: <defaults>
</compile_context>

<pallas_src>
import math

import jax
import jax.numpy as jnp
from jax import lax
from jax.experimental import pallas as pl
from jax.experimental.pallas import tpu as pltpu

# Small, module-consistent shapes.
B, T, D, H, FF = 2, 8, 32, 4, 64
DH = D // H
N = B * T


def _full_spec(shape):
    rank = len(shape)
    return pl.BlockSpec(shape, lambda i: (0,) * rank)


# ----------------------------------------------------------------------------
# Pallas kernel 1: fused single-layer transformer encoder, whole batch in one
# grid step.  x is the flattened (B*T, D) sequence; segment IDs carry both the
# batch partition and (for DLWT) the local-window partition.
# ----------------------------------------------------------------------------
def encoder_kernel(x_ref, segc_ref, segr_ref, wqkvo_ref, w1_ref, w2_ref, vec_ref,
                   out_ref, colsum_ref):
    f32 = jnp.float32
    n, d = x_ref.shape
    ff = w1_ref.shape[1]
    dh = d // H

    x = x_ref[...]                                            # (N, D) f32

    # In-kernel mask from segment IDs (O(T) input instead of dense (T,T) f32).
    allowed = segc_ref[...] == segr_ref[...]                  # (N,1)==(1,N) -> (N,N)
    # Plain Python-float branches -> jaxpr literals, nothing captured.
    mask_bias = jnp.where(allowed, 0.0, -1e30).astype(f32)

    scale = 1.0 / math.sqrt(dh)                               # Python float literal
    attn_out = jnp.zeros((n, d), f32)
    colsum = jnp.zeros((1, n), f32)

    for h in range(H):                                        # static head loop
        a, b = h * dh, (h + 1) * dh
        # Static ref-view slices of the packed weights / biases — no lane
        # slicing of activations, no concatenate.
        qh = jnp.dot(x, wqkvo_ref[:, a:b], preferred_element_type=f32) + vec_ref[0:1, a:b]
        kh = jnp.dot(x, wqkvo_ref[:, d + a:d + b], preferred_element_type=f32) + vec_ref[1:2, a:b]
        vh = jnp.dot(x, wqkvo_ref[:, 2 * d + a:2 * d + b], preferred_element_type=f32) + vec_ref[2:3, a:b]

        s = lax.dot_general(qh, kh, (((1,), (1,)), ((), ())),
                            preferred_element_type=f32) * scale + mask_bias
        s = s - jnp.max(s, axis=-1, keepdims=True)
        p = jnp.where(allowed, jnp.exp(s), 0.0)               # exact zeros off-segment
        p = p / jnp.sum(p, axis=-1, keepdims=True)

        # Column sums of the per-head attention probabilities (off-segment
        # entries are exactly 0, so summing over all rows == per-batch sum).
        colsum = colsum + jnp.sum(p, axis=0, keepdims=True)

        ctx = jnp.dot(p, vh, preferred_element_type=f32)      # (N, DH)
        attn_out = attn_out + jnp.dot(ctx, wqkvo_ref[a:b, 3 * d:4 * d],
                                      preferred_element_type=f32)

    attn_out = attn_out + vec_ref[3:4, :d]                    # output-proj bias

    def layer_norm(z, g, bta):
        mu = jnp.mean(z, axis=-1, keepdims=True)
        var = jnp.mean((z - mu) * (z - mu), axis=-1, keepdims=True)
        return (z - mu) * lax.rsqrt(var + 1e-5) * g + bta

    h1 = layer_norm(x + attn_out, vec_ref[6:7, :d], vec_ref[7:8, :d])
    z = jnp.maximum(jnp.dot(h1, w1_ref[...], preferred_element_type=f32)
                    + vec_ref[4:5, :ff], 0.0)
    z = jnp.dot(z, w2_ref[...], preferred_element_type=f32) + vec_ref[5:6, :d]
    y = layer_norm(h1 + z, vec_ref[8:9, :d], vec_ref[9:10, :d])

    out_ref[...] = y.astype(out_ref.dtype)
    colsum_ref[...] = (colsum * (1.0 / H)).astype(colsum_ref.dtype)  # head-averaged


def run_encoder(xf, seg_col, seg_row, params):
    wqkvo, w1, w2, vec = params
    n, d = xf.shape
    out = pl.pallas_call(
        encoder_kernel,
        grid=(1,),
        in_specs=[_full_spec(xf.shape), _full_spec(seg_col.shape), _full_spec(seg_row.shape),
                  _full_spec(wqkvo.shape), _full_spec(w1.shape), _full_spec(w2.shape),
                  _full_spec(vec.shape)],
        out_specs=(_full_spec((n, d)), _full_spec((1, n))),
        out_shape=(jax.ShapeDtypeStruct((n, d), jnp.float32),
                   jax.ShapeDtypeStruct((1, n), jnp.float32)),
        compiler_params=pltpu.CompilerParams(dimension_semantics=("arbitrary",)),
    )(xf, seg_col, seg_row, wqkvo, w1, w2, vec)
    return out[0], out[1]


# ----------------------------------------------------------------------------
# Pallas kernel 2: window_weighted_sum — whole batch in one grid step; the
# per-token weight scales the (W, T) mapping operand, not the (T, D) output.
# ----------------------------------------------------------------------------
def window_sum_kernel(wm_ref, y_ref, w_ref, out_ref):
    for b in range(wm_ref.shape[0]):                          # static batch loop
        scaled = wm_ref[b] * w_ref[b]                         # (W,T) * (1,T)
        out_ref[b] = jnp.dot(scaled, y_ref[b],
                             preferred_element_type=jnp.float32).astype(out_ref.dtype)


def window_weighted_sum(window_mapping, y, w):
    bsz, wn, t = window_mapping.shape
    d = y.shape[-1]
    w3 = w.reshape(bsz, 1, t)
    return pl.pallas_call(
        window_sum_kernel,
        grid=(1,),
        in_specs=[_full_spec(window_mapping.shape), _full_spec(y.shape), _full_spec(w3.shape)],
        out_specs=_full_spec((bsz, wn, d)),
        out_shape=jax.ShapeDtypeStruct((bsz, wn, d), jnp.float32),
        compiler_params=pltpu.CompilerParams(dimension_semantics=("arbitrary",)),
    )(window_mapping, y, w3)


# ----------------------------------------------------------------------------
# Parameter init (deterministic, synthetic), packed layout:
#   wqkvo: (D, 4D) = [Wq | Wk | Wv | Wo]
#   vec:   (16, FF) rows: 0 bq, 1 bk, 2 bv, 3 bo, 4 b1, 5 b2,
#                         6 ln1_gamma, 7 ln1_beta, 8 ln2_gamma, 9 ln2_beta
# ----------------------------------------------------------------------------
def init_layer_params(key):
    ks = jax.random.split(key, 6)

    def lin(k, fi, fo):
        return jax.random.normal(k, (fi, fo), jnp.float32) / math.sqrt(fi)

    wq, wk, wv, wo = (lin(ks[0], D, D), lin(ks[1], D, D),
                      lin(ks[2], D, D), lin(ks[3], D, D))
    w1, w2 = lin(ks[4], D, FF), lin(ks[5], FF, D)
    wqkvo = jnp.concatenate([wq, wk, wv, wo], axis=1)         # (D, 4D) = (32, 128)
    vec = jnp.zeros((16, FF), jnp.float32)
    vec = vec.at[6, :D].set(1.0).at[8, :D].set(1.0)           # LayerNorm gammas = 1
    return (wqkvo, w1, w2, vec)


# ----------------------------------------------------------------------------
# ModifiedDWBlock.forward — everything data-independent under one jit.
# ----------------------------------------------------------------------------
@jax.jit
def modified_dw_block_core(x, params_vanilla, params_dlwt):
    bsz, t, d = x.shape
    n = bsz * t
    xf = x.reshape(n, d)

    # Vanilla transformer: attention confined to each batch element.
    batch_seg = jnp.repeat(jnp.arange(bsz, dtype=jnp.float32), t)
    out_v, colsum_v = run_encoder(xf, batch_seg.reshape(n, 1),
                                  batch_seg.reshape(1, n), params_vanilla)
    aw_v = jax.nn.softmax(colsum_v.reshape(bsz, t), axis=-1)

    # generate_local_window_mask_v2: windows = maximal runs of constant
    # (weight >= threshold), expressed as per-token window IDs (cumsum of run
    # boundaries), statically bounded by T windows per batch element.
    ge = aw_v >= 0.5
    changes = (ge[:, 1:] != ge[:, :-1]).astype(jnp.int32)
    seg = jnp.concatenate([jnp.zeros((bsz, 1), jnp.int32),
                           jnp.cumsum(changes, axis=1)], axis=1)          # (bsz, t)

    # DLWT: attention allowed only within the same (batch, window) segment —
    # identical to the reference's per-head (b*h, t, t) additive-mask expansion.
    gseg = (jnp.arange(bsz, dtype=jnp.int32)[:, None] * t + seg).astype(jnp.float32)
    out_d, colsum_d = run_encoder(out_v, gseg.reshape(n, 1),
                                  gseg.reshape(1, n), params_dlwt)

    # torch.isneginf(...) zeroing in the reference is a no-op on probabilities.
    aw_d = jax.nn.softmax(colsum_d.reshape(bsz, t), axis=-1)

    window_mapping = (jnp.arange(t, dtype=jnp.int32)[None, :, None]
                      == seg[:, None, :]).astype(jnp.float32)             # (bsz, t, t)
    word_tokens = window_weighted_sum(window_mapping, out_d.reshape(bsz, t, d), aw_d)
    num_windows = jnp.max(seg[:, -1]) + 1
    return word_tokens, window_mapping, num_windows


def modified_dw_block_forward(x, params_vanilla, params_dlwt):
    word_full, wm_full, num_windows = modified_dw_block_core(x, params_vanilla, params_dlwt)
    # TODO(synk): the reference truncates to the batch-wise max window count —
    # a data-dependent shape; done with a single host sync at the very end.
    nw = int(num_windows)
    word_tokens = word_full[:, :nw]
    window_mapping = wm_full[:, :nw]
    return jnp.concatenate((word_tokens, x), axis=1), window_mapping


if __name__ == "__main__":
    key = jax.random.PRNGKey(0)
    kx, k1, k2 = jax.random.split(key, 3)
    x = jax.random.normal(kx, (B, T, D), jnp.float32)
    params_vanilla = init_layer_params(k1)
    params_dlwt = init_layer_params(k2)

    out, window_mapping = modified_dw_block_forward(x, params_vanilla, params_dlwt)
    out = jax.block_until_ready(out)
    window_mapping = jax.block_until_ready(window_mapping)

    assert out.shape[0] == B and out.shape[2] == D
    assert out.shape[1] == window_mapping.shape[1] + T
    print("KERNEL_OK")
</pallas_src>

<mosaic_0001>
module attributes {stable_mosaic.version = 11 : i64} {
  func.func @encoder_kernel(%arg0: i32, %arg1: memref<16x32xf32, #tpu.memory_space<vmem>>, %arg2: memref<16x1xf32, #tpu.memory_space<vmem>>, %arg3: memref<1x16xf32, #tpu.memory_space<vmem>>, %arg4: memref<32x128xf32, #tpu.memory_space<vmem>>, %arg5: memref<32x64xf32, #tpu.memory_space<vmem>>, %arg6: memref<64x32xf32, #tpu.memory_space<vmem>>, %arg7: memref<16x64xf32, #tpu.memory_space<vmem>>, %arg8: memref<16x32xf32, #tpu.memory_space<vmem>>, %arg9: memref<1x16xf32, #tpu.memory_space<vmem>>) attributes {dimension_semantics = [#tpu.dimension_semantics<arbitrary>], iteration_bounds = array<i64: 1>, scalar_prefetch = 0 : i64, scratch_operands = 0 : i64, tpu.core_type = #tpu.core_type<tc>, window_params = [{pipeline_mode = #tpu.pipeline_mode<synchronous>, transform_indices = @transform_0, window_bounds = array<i64: 16, 32>}, {pipeline_mode = #tpu.pipeline_mode<synchronous>, transform_indices = @transform_1, window_bounds = array<i64: 16, 1>}, {pipeline_mode = #tpu.pipeline_mode<synchronous>, transform_indices = @transform_2, window_bounds = array<i64: 1, 16>}, {pipeline_mode = #tpu.pipeline_mode<synchronous>, transform_indices = @transform_3, window_bounds = array<i64: 32, 128>}, {pipeline_mode = #tpu.pipeline_mode<synchronous>, transform_indices = @transform_4, window_bounds = array<i64: 32, 64>}, {pipeline_mode = #tpu.pipeline_mode<synchronous>, transform_indices = @transform_5, window_bounds = array<i64: 64, 32>}, {pipeline_mode = #tpu.pipeline_mode<synchronous>, transform_indices = @transform_6, window_bounds = array<i64: 16, 64>}, {pipeline_mode = #tpu.pipeline_mode<synchronous>, transform_indices = @transform_7, window_bounds = array<i64: 16, 32>}, {pipeline_mode = #tpu.pipeline_mode<synchronous>, transform_indices = @transform_8, window_bounds = array<i64: 1, 16>}]} {
    %c0 = arith.constant 0 : index
    %c0_0 = arith.constant 0 : index
    %0 = vector.load %arg1[%c0, %c0_0] : memref<16x32xf32, #tpu.memory_space<vmem>>, vector<16x32xf32>
    %c0_1 = arith.constant 0 : index
    %c0_2 = arith.constant 0 : index
    %1 = vector.load %arg2[%c0_1, %c0_2] : memref<16x1xf32, #tpu.memory_space<vmem>>, vector<16x1xf32>
    %c0_3 = arith.constant 0 : index
    %c0_4 = arith.constant 0 : index
    %2 = vector.load %arg3[%c0_3, %c0_4] : memref<1x16xf32, #tpu.memory_space<vmem>>, vector<1x16xf32>
    %3 = vector.broadcast %1 : vector<16x1xf32> to vector<16x16xf32>
    %4 = vector.broadcast %2 : vector<1x16xf32> to vector<16x16xf32>
    %5 = arith.cmpf oeq, %3, %4 : vector<16x16xf32>
    %cst = arith.constant 0.000000e+00 : f32
    %cst_5 = arith.constant -1.000000e+30 : f32
    %6 = vector.broadcast %cst : f32 to vector<16x16xf32>
    %7 = vector.broadcast %cst_5 : f32 to vector<16x16xf32>
    %8 = arith.select %5, %6, %7 : vector<16x16xi1>, vector<16x16xf32>
    %cst_6 = arith.constant 0.000000e+00 : f32
    %9 = vector.broadcast %cst_6 : f32 to vector<16x32xf32>
    %cst_7 = arith.constant 0.000000e+00 : f32
    %10 = vector.broadcast %cst_7 : f32 to vector<1x16xf32>
    %c0_8 = arith.constant 0 : index
    %c0_9 = arith.constant 0 : index
    %11 = vector.load %arg4[%c0_8, %c0_9] : memref<32x128xf32, #tpu.memory_space<vmem>>, vector<32x8xf32>
    %cst_10 = arith.constant dense<0.000000e+00> : vector<16x8xf32>
    %12 = tpu.matmul %0, %11, %cst_10 {dimension_numbers = #tpu.dot_dimension_numbers<[1], [0], [0], [1], [0, 0, 1, 1], [], []>} : vector<16x32xf32>, vector<32x8xf32>, vector<16x8xf32> -> vector<16x8xf32>
    %c0_11 = arith.constant 0 : index
    %c0_12 = arith.constant 0 : index
    %13 = vector.load %arg7[%c0_11, %c0_12] : memref<16x64xf32, #tpu.memory_space<vmem>>, vector<1x8xf32>
    %14 = vector.broadcast %13 : vector<1x8xf32> to vector<16x8xf32>
    %15 = arith.addf %12, %14 : vector<16x8xf32>
    %c0_13 = arith.constant 0 : index
    %c32 = arith.constant 32 : index
    %16 = vector.load %arg4[%c0_13, %c32] : memref<32x128xf32, #tpu.memory_space<vmem>>, vector<32x8xf32>
    %cst_14 = arith.constant dense<0.000000e+00> : vector<16x8xf32>
    %17 = tpu.matmul %0, %16, %cst_14 {dimension_numbers = #tpu.dot_dimension_numbers<[1], [0], [0], [1], [0, 0, 1, 1], [], []>} : vector<16x32xf32>, vector<32x8xf32>, vector<16x8xf32> -> vector<16x8xf32>
    %c1 = arith.constant 1 : index
    %c0_15 = arith.constant 0 : index
    %18 = vector.load %arg7[%c1, %c0_15] : memref<16x64xf32, #tpu.memory_space<vmem>>, vector<1x8xf32>
    %19 = vector.broadcast %18 : vector<1x8xf32> to vector<16x8xf32>
    %20 = arith.addf %17, %19 : vector<16x8xf32>
    %c0_16 = arith.constant 0 : index
    %c64 = arith.constant 64 : index
    %21 = vector.load %arg4[%c0_16, %c64] : memref<32x128xf32, #tpu.memory_space<vmem>>, vector<32x8xf32>
    %cst_17 = arith.constant dense<0.000000e+00> : vector<16x8xf32>
    %22 = tpu.matmul %0, %21, %cst_17 {dimension_numbers = #tpu.dot_dimension_numbers<[1], [0], [0], [1], [0, 0, 1, 1], [], []>} : vector<16x32xf32>, vector<32x8xf32>, vector<16x8xf32> -> vector<16x8xf32>
    %c2 = arith.constant 2 : index
    %c0_18 = arith.constant 0 : index
    %23 = vector.load %arg7[%c2, %c0_18] : memref<16x64xf32, #tpu.memory_space<vmem>>, vector<1x8xf32>
    %24 = vector.broadcast %23 : vector<1x8xf32> to vector<16x8xf32>
    %25 = arith.addf %22, %24 : vector<16x8xf32>
    %cst_19 = arith.constant dense<0.000000e+00> : vector<16x16xf32>
    %26 = tpu.matmul %15, %20, %cst_19 {dimension_numbers = #tpu.dot_dimension_numbers<[1], [1], [0], [0], [0, 0, 1, 0], [], []>} : vector<16x8xf32>, vector<16x8xf32>, vector<16x16xf32> -> vector<16x16xf32>
    %cst_20 = arith.constant 0.353553385 : f32
    %27 = vector.broadcast %cst_20 : f32 to vector<16x16xf32>
    %28 = arith.mulf %26, %27 : vector<16x16xf32>
    %29 = arith.addf %28, %8 : vector<16x16xf32>
    %cst_21 = arith.constant dense<0xFF800000> : vector<16xf32>
    %30 = vector.multi_reduction <maximumf>, %29, %cst_21 [1] : vector<16x16xf32> to vector<16xf32>
    %31 = vector.shape_cast %30 : vector<16xf32> to vector<16x1xf32>
    %32 = vector.broadcast %31 : vector<16x1xf32> to vector<16x16xf32>
    %33 = arith.subf %29, %32 : vector<16x16xf32>
    %34 = math.exp %33 : vector<16x16xf32>
    %cst_22 = arith.constant 0.000000e+00 : f32
    %35 = vector.broadcast %cst_22 : f32 to vector<16x16xf32>
    %36 = arith.select %5, %34, %35 : vector<16x16xi1>, vector<16x16xf32>
    %cst_23 = arith.constant dense<0.000000e+00> : vector<16xf32>
    %37 = vector.multi_reduction <add>, %36, %cst_23 [1] : vector<16x16xf32> to vector<16xf32>
    %38 = vector.shape_cast %37 : vector<16xf32> to vector<16x1xf32>
    %39 = vector.broadcast %38 : vector<16x1xf32> to vector<16x16xf32>
    %40 = arith.divf %36, %39 : vector<16x16xf32>
    %cst_24 = arith.constant dense<0.000000e+00> : vector<16xf32>
    %41 = vector.multi_reduction <add>, %40, %cst_24 [0] : vector<16x16xf32> to vector<16xf32>
    %42 = vector.shape_cast %41 : vector<16xf32> to vector<1x16xf32>
    %43 = arith.addf %10, %42 : vector<1x16xf32>
    %cst_25 = arith.constant dense<0.000000e+00> : vector<16x8xf32>
    %44 = tpu.matmul %40, %25, %cst_25 {dimension_numbers = #tpu.dot_dimension_numbers<[1], [0], [0], [1], [0, 0, 1, 1], [], []>} : vector<16x16xf32>, vector<16x8xf32>, vector<16x8xf32> -> vector<16x8xf32>
    %c0_26 = arith.constant 0 : index
    %c96 = arith.constant 96 : index
    %45 = vector.load %arg4[%c0_26, %c96] : memref<32x128xf32, #tpu.memory_space<vmem>>, vector<8x32xf32>
    %cst_27 = arith.constant dense<0.000000e+00> : vector<16x32xf32>
    %46 = tpu.matmul %44, %45, %cst_27 {dimension_numbers = #tpu.dot_dimension_numbers<[1], [0], [0], [1], [0, 0, 1, 1], [], []>} : vector<16x8xf32>, vector<8x32xf32>, vector<16x32xf32> -> vector<16x32xf32>
    %47 = arith.addf %9, %46 : vector<16x32xf32>
    %c0_28 = arith.constant 0 : index
    %c8 = arith.constant 8 : index
    %48 = vector.load %arg4[%c0_28, %c8] : memref<32x128xf32, #tpu.memory_space<vmem>>, vector<32x8xf32>
    %cst_29 = arith.constant dense<0.000000e+00> : vector<16x8xf32>
    %49 = tpu.matmul %0, %48, %cst_29 {dimension_numbers = #tpu.dot_dimension_numbers<[1], [0], [0], [1], [0, 0, 1, 1], [], []>} : vector<16x32xf32>, vector<32x8xf32>, vector<16x8xf32> -> vector<16x8xf32>
    %c0_30 = arith.constant 0 : index
    %c8_31 = arith.constant 8 : index
    %50 = vector.load %arg7[%c0_30, %c8_31] : memref<16x64xf32, #tpu.memory_space<vmem>>, vector<1x8xf32>
    %51 = vector.broadcast %50 : vector<1x8xf32> to vector<16x8xf32>
    %52 = arith.addf %49, %51 : vector<16x8xf32>
    %c0_32 = arith.constant 0 : index
    %c40 = arith.constant 40 : index
    %53 = vector.load %arg4[%c0_32, %c40] : memref<32x128xf32, #tpu.memory_space<vmem>>, vector<32x8xf32>
    %cst_33 = arith.constant dense<0.000000e+00> : vector<16x8xf32>
    %54 = tpu.matmul %0, %53, %cst_33 {dimension_numbers = #tpu.dot_dimension_numbers<[1], [0], [0], [1], [0, 0, 1, 1], [], []>} : vector<16x32xf32>, vector<32x8xf32>, vector<16x8xf32> -> vector<16x8xf32>
    %c1_34 = arith.constant 1 : index
    %c8_35 = arith.constant 8 : index
    %55 = vector.load %arg7[%c1_34, %c8_35] : memref<16x64xf32, #tpu.memory_space<vmem>>, vector<1x8xf32>
    %56 = vector.broadcast %55 : vector<1x8xf32> to vector<16x8xf32>
    %57 = arith.addf %54, %56 : vector<16x8xf32>
    %c0_36 = arith.constant 0 : index
    %c72 = arith.constant 72 : index
    %58 = vector.load %arg4[%c0_36, %c72] : memref<32x128xf32, #tpu.memory_space<vmem>>, vector<32x8xf32>
    %cst_37 = arith.constant dense<0.000000e+00> : vector<16x8xf32>
    %59 = tpu.matmul %0, %58, %cst_37 {dimension_numbers = #tpu.dot_dimension_numbers<[1], [0], [0], [1], [0, 0, 1, 1], [], []>} : vector<16x32xf32>, vector<32x8xf32>, vector<16x8xf32> -> vector<16x8xf32>
    %c2_38 = arith.constant 2 : index
    %c8_39 = arith.constant 8 : index
    %60 = vector.load %arg7[%c2_38, %c8_39] : memref<16x64xf32, #tpu.memory_space<vmem>>, vector<1x8xf32>
    %61 = vector.broadcast %60 : vector<1x8xf32> to vector<16x8xf32>
    %62 = arith.addf %59, %61 : vector<16x8xf32>
    %cst_40 = arith.constant dense<0.000000e+00> : vector<16x16xf32>
    %63 = tpu.matmul %52, %57, %cst_40 {dimension_numbers = #tpu.dot_dimension_numbers<[1], [1], [0], [0], [0, 0, 1, 0], [], []>} : vector<16x8xf32>, vector<16x8xf32>, vector<16x16xf32> -> vector<16x16xf32>
    %cst_41 = arith.constant 0.353553385 : f32
    %64 = vector.broadcast %cst_41 : f32 to vector<16x16xf32>
    %65 = arith.mulf %63, %64 : vector<16x16xf32>
    %66 = arith.addf %65, %8 : vector<16x16xf32>
    %cst_42 = arith.constant dense<0xFF800000> : vector<16xf32>
    %67 = vector.multi_reduction <maximumf>, %66, %cst_42 [1] : vector<16x16xf32> to vector<16xf32>
    %68 = vector.shape_cast %67 : vector<16xf32> to vector<16x1xf32>
    %69 = vector.broadcast %68 : vector<16x1xf32> to vector<16x16xf32>
    %70 = arith.subf %66, %69 : vector<16x16xf32>
    %71 = math.exp %70 : vector<16x16xf32>
    %cst_43 = arith.constant 0.000000e+00 : f32
    %72 = vector.broadcast %cst_43 : f32 to vector<16x16xf32>
    %73 = arith.select %5, %71, %72 : vector<16x16xi1>, vector<16x16xf32>
    %cst_44 = arith.constant dense<0.000000e+00> : vector<16xf32>
    %74 = vector.multi_reduction <add>, %73, %cst_44 [1] : vector<16x16xf32> to vector<16xf32>
    %75 = vector.shape_cast %74 : vector<16xf32> to vector<16x1xf32>
    %76 = vector.broadcast %75 : vector<16x1xf32> to vector<16x16xf32>
    %77 = arith.divf %73, %76 : vector<16x16xf32>
    %cst_45 = arith.constant dense<0.000000e+00> : vector<16xf32>
    %78 = vector.multi_reduction <add>, %77, %cst_45 [0] : vector<16x16xf32> to vector<16xf32>
    %79 = vector.shape_cast %78 : vector<16xf32> to vector<1x16xf32>
    %80 = arith.addf %43, %79 : vector<1x16xf32>
    %cst_46 = arith.constant dense<0.000000e+00> : vector<16x8xf32>
    %81 = tpu.matmul %77, %62, %cst_46 {dimension_numbers = #tpu.dot_dimension_numbers<[1], [0], [0], [1], [0, 0, 1, 1], [], []>} : vector<16x16xf32>, vector<16x8xf32>, vector<16x8xf32> -> vector<16x8xf32>
    %c8_47 = arith.constant 8 : index
    %c96_48 = arith.constant 96 : index
    %82 = vector.load %arg4[%c8_47, %c96_48] : memref<32x128xf32, #tpu.memory_space<vmem>>, vector<8x32xf32>
    %cst_49 = arith.constant dense<0.000000e+00> : vector<16x32xf32>
    %83 = tpu.matmul %81, %82, %cst_49 {dimension_numbers = #tpu.dot_dimension_numbers<[1], [0], [0], [1], [0, 0, 1, 1], [], []>} : vector<16x8xf32>, vector<8x32xf32>, vector<16x32xf32> -> vector<16x32xf32>
    %84 = arith.addf %47, %83 : vector<16x32xf32>
    %c0_50 = arith.constant 0 : index
    %c16 = arith.constant 16 : index
    %85 = vector.load %arg4[%c0_50, %c16] : memref<32x128xf32, #tpu.memory_space<vmem>>, vector<32x8xf32>
    %cst_51 = arith.constant dense<0.000000e+00> : vector<16x8xf32>
    %86 = tpu.matmul %0, %85, %cst_51 {dimension_numbers = #tpu.dot_dimension_numbers<[1], [0], [0], [1], [0, 0, 1, 1], [], []>} : vector<16x32xf32>, vector<32x8xf32>, vector<16x8xf32> -> vector<16x8xf32>
    %c0_52 = arith.constant 0 : index
    %c16_53 = arith.constant 16 : index
    %87 = vector.load %arg7[%c0_52, %c16_53] : memref<16x64xf32, #tpu.memory_space<vmem>>, vector<1x8xf32>
    %88 = vector.broadcast %87 : vector<1x8xf32> to vector<16x8xf32>
    %89 = arith.addf %86, %88 : vector<16x8xf32>
    %c0_54 = arith.constant 0 : index
    %c48 = arith.constant 48 : index
    %90 = vector.load %arg4[%c0_54, %c48] : memref<32x128xf32, #tpu.memory_space<vmem>>, vector<32x8xf32>
    %cst_55 = arith.constant dense<0.000000e+00> : vector<16x8xf32>
    %91 = tpu.matmul %0, %90, %cst_55 {dimension_numbers = #tpu.dot_dimension_numbers<[1], [0], [0], [1], [0, 0, 1, 1], [], []>} : vector<16x32xf32>, vector<32x8xf32>, vector<16x8xf32> -> vector<16x8xf32>
    %c1_56 = arith.constant 1 : index
    %c16_57 = arith.constant 16 : index
    %92 = vector.load %arg7[%c1_56, %c16_57] : memref<16x64xf32, #tpu.memory_space<vmem>>, vector<1x8xf32>
    %93 = vector.broadcast %92 : vector<1x8xf32> to vector<16x8xf32>
    %94 = arith.addf %91, %93 : vector<16x8xf32>
    %c0_58 = arith.constant 0 : index
    %c80 = arith.constant 80 : index
    %95 = vector.load %arg4[%c0_58, %c80] : memref<32x128xf32, #tpu.memory_space<vmem>>, vector<32x8xf32>
    %cst_59 = arith.constant dense<0.000000e+00> : vector<16x8xf32>
    %96 = tpu.matmul %0, %95, %cst_59 {dimension_numbers = #tpu.dot_dimension_numbers<[1], [0], [0], [1], [0, 0, 1, 1], [], []>} : vector<16x32xf32>, vector<32x8xf32>, vector<16x8xf32> -> vector<16x8xf32>
    %c2_60 = arith.constant 2 : index
    %c16_61 = arith.constant 16 : index
    %97 = vector.load %arg7[%c2_60, %c16_61] : memref<16x64xf32, #tpu.memory_space<vmem>>, vector<1x8xf32>
    %98 = vector.broadcast %97 : vector<1x8xf32> to vector<16x8xf32>
    %99 = arith.addf %96, %98 : vector<16x8xf32>
    %cst_62 = arith.constant dense<0.000000e+00> : vector<16x16xf32>
    %100 = tpu.matmul %89, %94, %cst_62 {dimension_numbers = #tpu.dot_dimension_numbers<[1], [1], [0], [0], [0, 0, 1, 0], [], []>} : vector<16x8xf32>, vector<16x8xf32>, vector<16x16xf32> -> vector<16x16xf32>
    %cst_63 = arith.constant 0.353553385 : f32
    %101 = vector.broadcast %cst_63 : f32 to vector<16x16xf32>
    %102 = arith.mulf %100, %101 : vector<16x16xf32>
    %103 = arith.addf %102, %8 : vector<16x16xf32>
    %cst_64 = arith.constant dense<0xFF800000> : vector<16xf32>
    %104 = vector.multi_reduction <maximumf>, %103, %cst_64 [1] : vector<16x16xf32> to vector<16xf32>
    %105 = vector.shape_cast %104 : vector<16xf32> to vector<16x1xf32>
    %106 = vector.broadcast %105 : vector<16x1xf32> to vector<16x16xf32>
    %107 = arith.subf %103, %106 : vector<16x16xf32>
    %108 = math.exp %107 : vector<16x16xf32>
    %cst_65 = arith.constant 0.000000e+00 : f32
    %109 = vector.broadcast %cst_65 : f32 to vector<16x16xf32>
    %110 = arith.select %5, %108, %109 : vector<16x16xi1>, vector<16x16xf32>
    %cst_66 = arith.constant dense<0.000000e+00> : vector<16xf32>
    %111 = vector.multi_reduction <add>, %110, %cst_66 [1] : vector<16x16xf32> to vector<16xf32>
    %112 = vector.shape_cast %111 : vector<16xf32> to vector<16x1xf32>
    %113 = vector.broadcast %112 : vector<16x1xf32> to vector<16x16xf32>
    %114 = arith.divf %110, %113 : vector<16x16xf32>
    %cst_67 = arith.constant dense<0.000000e+00> : vector<16xf32>
    %115 = vector.multi_reduction <add>, %114, %cst_67 [0] : vector<16x16xf32> to vector<16xf32>
    %116 = vector.shape_cast %115 : vector<16xf32> to vector<1x16xf32>
    %117 = arith.addf %80, %116 : vector<1x16xf32>
    %cst_68 = arith.constant dense<0.000000e+00> : vector<16x8xf32>
    %118 = tpu.matmul %114, %99, %cst_68 {dimension_numbers = #tpu.dot_dimension_numbers<[1], [0], [0], [1], [0, 0, 1, 1], [], []>} : vector<16x16xf32>, vector<16x8xf32>, vector<16x8xf32> -> vector<16x8xf32>
    %c16_69 = arith.constant 16 : index
    %c96_70 = arith.constant 96 : index
    %119 = vector.load %arg4[%c16_69, %c96_70] : memref<32x128xf32, #tpu.memory_space<vmem>>, vector<8x32xf32>
    %cst_71 = arith.constant dense<0.000000e+00> : vector<16x32xf32>
    %120 = tpu.matmul %118, %119, %cst_71 {dimension_numbers = #tpu.dot_dimension_numbers<[1], [0], [0], [1], [0, 0, 1, 1], [], []>} : vector<16x8xf32>, vector<8x32xf32>, vector<16x32xf32> -> vector<16x32xf32>
    %121 = arith.addf %84, %120 : vector<16x32xf32>
    %c0_72 = arith.constant 0 : index
    %c24 = arith.constant 24 : index
    %122 = vector.load %arg4[%c0_72, %c24] : memref<32x128xf32, #tpu.memory_space<vmem>>, vector<32x8xf32>
    %cst_73 = arith.constant dense<0.000000e+00> : vector<16x8xf32>
    %123 = tpu.matmul %0, %122, %cst_73 {dimension_numbers = #tpu.dot_dimension_numbers<[1], [0], [0], [1], [0, 0, 1, 1], [], []>} : vector<16x32xf32>, vector<32x8xf32>, vector<16x8xf32> -> vector<16x8xf32>
    %c0_74 = arith.constant 0 : index
    %c24_75 = arith.constant 24 : index
    %124 = vector.load %arg7[%c0_74, %c24_75] : memref<16x64xf32, #tpu.memory_space<vmem>>, vector<1x8xf32>
    %125 = vector.broadcast %124 : vector<1x8xf32> to vector<16x8xf32>
    %126 = arith.addf %123, %125 : vector<16x8xf32>
    %c0_76 = arith.constant 0 : index
    %c56 = arith.constant 56 : index
    %127 = vector.load %arg4[%c0_76, %c56] : memref<32x128xf32, #tpu.memory_space<vmem>>, vector<32x8xf32>
    %cst_77 = arith.constant dense<0.000000e+00> : vector<16x8xf32>
    %128 = tpu.matmul %0, %127, %cst_77 {dimension_numbers = #tpu.dot_dimension_numbers<[1], [0], [0], [1], [0, 0, 1, 1], [], []>} : vector<16x32xf32>, vector<32x8xf32>, vector<16x8xf32> -> vector<16x8xf32>
    %c1_78 = arith.constant 1 : index
    %c24_79 = arith.constant 24 : index
    %129 = vector.load %arg7[%c1_78, %c24_79] : memref<16x64xf32, #tpu.memory_space<vmem>>, vector<1x8xf32>
    %130 = vector.broadcast %129 : vector<1x8xf32> to vector<16x8xf32>
    %131 = arith.addf %128, %130 : vector<16x8xf32>
    %c0_80 = arith.constant 0 : index
    %c88 = arith.constant 88 : index
    %132 = vector.load %arg4[%c0_80, %c88] : memref<32x128xf32, #tpu.memory_space<vmem>>, vector<32x8xf32>
    %cst_81 = arith.constant dense<0.000000e+00> : vector<16x8xf32>
    %133 = tpu.matmul %0, %132, %cst_81 {dimension_numbers = #tpu.dot_dimension_numbers<[1], [0], [0], [1], [0, 0, 1, 1], [], []>} : vector<16x32xf32>, vector<32x8xf32>, vector<16x8xf32> -> vector<16x8xf32>
    %c2_82 = arith.constant 2 : index
    %c24_83 = arith.constant 24 : index
    %134 = vector.load %arg7[%c2_82, %c24_83] : memref<16x64xf32, #tpu.memory_space<vmem>>, vector<1x8xf32>
    %135 = vector.broadcast %134 : vector<1x8xf32> to vector<16x8xf32>
    %136 = arith.addf %133, %135 : vector<16x8xf32>
    %cst_84 = arith.constant dense<0.000000e+00> : vector<16x16xf32>
    %137 = tpu.matmul %126, %131, %cst_84 {dimension_numbers = #tpu.dot_dimension_numbers<[1], [1], [0], [0], [0, 0, 1, 0], [], []>} : vector<16x8xf32>, vector<16x8xf32>, vector<16x16xf32> -> vector<16x16xf32>
    %cst_85 = arith.constant 0.353553385 : f32
    %138 = vector.broadcast %cst_85 : f32 to vector<16x16xf32>
    %139 = arith.mulf %137, %138 : vector<16x16xf32>
    %140 = arith.addf %139, %8 : vector<16x16xf32>
    %cst_86 = arith.constant dense<0xFF800000> : vector<16xf32>
    %141 = vector.multi_reduction <maximumf>, %140, %cst_86 [1] : vector<16x16xf32> to vector<16xf32>
    %142 = vector.shape_cast %141 : vector<16xf32> to vector<16x1xf32>
    %143 = vector.broadcast %142 : vector<16x1xf32> to vector<16x16xf32>
    %144 = arith.subf %140, %143 : vector<16x16xf32>
    %145 = math.exp %144 : vector<16x16xf32>
    %cst_87 = arith.constant 0.000000e+00 : f32
    %146 = vector.broadcast %cst_87 : f32 to vector<16x16xf32>
    %147 = arith.select %5, %145, %146 : vector<16x16xi1>, vector<16x16xf32>
    %cst_88 = arith.constant dense<0.000000e+00> : vector<16xf32>
    %148 = vector.multi_reduction <add>, %147, %cst_88 [1] : vector<16x16xf32> to vector<16xf32>
    %149 = vector.shape_cast %148 : vector<16xf32> to vector<16x1xf32>
    %150 = vector.broadcast %149 : vector<16x1xf32> to vector<16x16xf32>
    %151 = arith.divf %147, %150 : vector<16x16xf32>
    %cst_89 = arith.constant dense<0.000000e+00> : vector<16xf32>
    %152 = vector.multi_reduction <add>, %151, %cst_89 [0] : vector<16x16xf32> to vector<16xf32>
    %153 = vector.shape_cast %152 : vector<16xf32> to vector<1x16xf32>
    %154 = arith.addf %117, %153 : vector<1x16xf32>
    %cst_90 = arith.constant dense<0.000000e+00> : vector<16x8xf32>
    %155 = tpu.matmul %151, %136, %cst_90 {dimension_numbers = #tpu.dot_dimension_numbers<[1], [0], [0], [1], [0, 0, 1, 1], [], []>} : vector<16x16xf32>, vector<16x8xf32>, vector<16x8xf32> -> vector<16x8xf32>
    %c24_91 = arith.constant 24 : index
    %c96_92 = arith.constant 96 : index
    %156 = vector.load %arg4[%c24_91, %c96_92] : memref<32x128xf32, #tpu.memory_space<vmem>>, vector<8x32xf32>
    %cst_93 = arith.constant dense<0.000000e+00> : vector<16x32xf32>
    %157 = tpu.matmul %155, %156, %cst_93 {dimension_numbers = #tpu.dot_dimension_numbers<[1], [0], [0], [1], [0, 0, 1, 1], [], []>} : vector<16x8xf32>, vector<8x32xf32>, vector<16x32xf32> -> vector<16x32xf32>
    %158 = arith.addf %121, %157 : vector<16x32xf32>
    %c3 = arith.constant 3 : index
    %c0_94 = arith.constant 0 : index
    %159 = vector.load %arg7[%c3, %c0_94] : memref<16x64xf32, #tpu.memory_space<vmem>>, vector<1x32xf32>
    %160 = vector.broadcast %159 : vector<1x32xf32> to vector<16x32xf32>
    %161 = arith.addf %158, %160 : vector<16x32xf32>
    %162 = arith.addf %0, %161 : vector<16x32xf32>
    %c6 = arith.constant 6 : index
    %c0_95 = arith.constant 0 : index
    %163 = vector.load %arg7[%c6, %c0_95] : memref<16x64xf32, #tpu.memory_space<vmem>>, vector<1x32xf32>
    %c7 = arith.constant 7 : index
    %c0_96 = arith.constant 0 : index
    %164 = vector.load %arg7[%c7, %c0_96] : memref<16x64xf32, #tpu.memory_space<vmem>>, vector<1x32xf32>
    %cst_97 = arith.constant dense<0.000000e+00> : vector<16xf32>
    %165 = vector.multi_reduction <add>, %162, %cst_97 [1] : vector<16x32xf32> to vector<16xf32>
    %166 = vector.shape_cast %165 : vector<16xf32> to vector<16x1xf32>
    %cst_98 = arith.constant 3.200000e+01 : f32
    %167 = vector.broadcast %cst_98 : f32 to vector<16x1xf32>
    %168 = arith.divf %166, %167 : vector<16x1xf32>
    %169 = vector.broadcast %168 : vector<16x1xf32> to vector<16x32xf32>
    %170 = arith.subf %162, %169 : vector<16x32xf32>
    %171 = vector.broadcast %168 : vector<16x1xf32> to vector<16x32xf32>
    %172 = arith.subf %162, %171 : vector<16x32xf32>
    %173 = arith.mulf %170, %172 : vector<16x32xf32>
    %cst_99 = arith.constant dense<0.000000e+00> : vector<16xf32>
    %174 = vector.multi_reduction <add>, %173, %cst_99 [1] : vector<16x32xf32> to vector<16xf32>
    %175 = vector.shape_cast %174 : vector<16xf32> to vector<16x1xf32>
    %cst_100 = arith.constant 3.200000e+01 : f32
    %176 = vector.broadcast %cst_100 : f32 to vector<16x1xf32>
    %177 = arith.divf %175, %176 : vector<16x1xf32>
    %178 = vector.broadcast %168 : vector<16x1xf32> to vector<16x32xf32>
    %179 = arith.subf %162, %178 : vector<16x32xf32>
    %cst_101 = arith.constant 9.99999974E-6 : f32
    %180 = vector.broadcast %cst_101 : f32 to vector<16x1xf32>
    %181 = arith.addf %177, %180 : vector<16x1xf32>
    %182 = math.rsqrt %181 : vector<16x1xf32>
    %183 = vector.broadcast %182 : vector<16x1xf32> to vector<16x32xf32>
    %184 = arith.mulf %179, %183 : vector<16x32xf32>
    %185 = vector.broadcast %163 : vector<1x32xf32> to vector<16x32xf32>
    %186 = arith.mulf %184, %185 : vector<16x32xf32>
    %187 = vector.broadcast %164 : vector<1x32xf32> to vector<16x32xf32>
    %188 = arith.addf %186, %187 : vector<16x32xf32>
    %c0_102 = arith.constant 0 : index
    %c0_103 = arith.constant 0 : index
    %189 = vector.load %arg5[%c0_102, %c0_103] : memref<32x64xf32, #tpu.memory_space<vmem>>, vector<32x64xf32>
    %cst_104 = arith.constant dense<0.000000e+00> : vector<16x64xf32>
    %190 = tpu.matmul %188, %189, %cst_104 {dimension_numbers = #tpu.dot_dimension_numbers<[1], [0], [0], [1], [0, 0, 1, 1], [], []>} : vector<16x32xf32>, vector<32x64xf32>, vector<16x64xf32> -> vector<16x64xf32>
    %c4 = arith.constant 4 : index
    %c0_105 = arith.constant 0 : index
    %191 = vector.load %arg7[%c4, %c0_105] : memref<16x64xf32, #tpu.memory_space<vmem>>, vector<1x64xf32>
    %192 = vector.broadcast %191 : vector<1x64xf32> to vector<16x64xf32>
    %193 = arith.addf %190, %192 : vector<16x64xf32>
    %cst_106 = arith.constant 0.000000e+00 : f32
    %194 = vector.broadcast %cst_106 : f32 to vector<16x64xf32>
    %195 = arith.maximumf %193, %194 : vector<16x64xf32>
    %c0_107 = arith.constant 0 : index
    %c0_108 = arith.constant 0 : index
    %196 = vector.load %arg6[%c0_107, %c0_108] : memref<64x32xf32, #tpu.memory_space<vmem>>, vector<64x32xf32>
    %cst_109 = arith.constant dense<0.000000e+00> : vector<16x32xf32>
    %197 = tpu.matmul %195, %196, %cst_109 {dimension_numbers = #tpu.dot_dimension_numbers<[1], [0], [0], [1], [0, 0, 1, 1], [], []>} : vector<16x64xf32>, vector<64x32xf32>, vector<16x32xf32> -> vector<16x32xf32>
    %c5 = arith.constant 5 : index
    %c0_110 = arith.constant 0 : index
    %198 = vector.load %arg7[%c5, %c0_110] : memref<16x64xf32, #tpu.memory_space<vmem>>, vector<1x32xf32>
    %199 = vector.broadcast %198 : vector<1x32xf32> to vector<16x32xf32>
    %200 = arith.addf %197, %199 : vector<16x32xf32>
    %201 = arith.addf %188, %200 : vector<16x32xf32>
    %c8_111 = arith.constant 8 : index
    %c0_112 = arith.constant 0 : index
    %202 = vector.load %arg7[%c8_111, %c0_112] : memref<16x64xf32, #tpu.memory_space<vmem>>, vector<1x32xf32>
    %c9 = arith.constant 9 : index
    %c0_113 = arith.constant 0 : index
    %203 = vector.load %arg7[%c9, %c0_113] : memref<16x64xf32, #tpu.memory_space<vmem>>, vector<1x32xf32>
    %cst_114 = arith.constant dense<0.000000e+00> : vector<16xf32>
    %204 = vector.multi_reduction <add>, %201, %cst_114 [1] : vector<16x32xf32> to vector<16xf32>
    %205 = vector.shape_cast %204 : vector<16xf32> to vector<16x1xf32>
    %cst_115 = arith.constant 3.200000e+01 : f32
    %206 = vector.broadcast %cst_115 : f32 to vector<16x1xf32>
    %207 = arith.divf %205, %206 : vector<16x1xf32>
    %208 = vector.broadcast %207 : vector<16x1xf32> to vector<16x32xf32>
    %209 = arith.subf %201, %208 : vector<16x32xf32>
    %210 = vector.broadcast %207 : vector<16x1xf32> to vector<16x32xf32>
    %211 = arith.subf %201, %210 : vector<16x32xf32>
    %212 = arith.mulf %209, %211 : vector<16x32xf32>
    %cst_116 = arith.constant dense<0.000000e+00> : vector<16xf32>
    %213 = vector.multi_reduction <add>, %212, %cst_116 [1] : vector<16x32xf32> to vector<16xf32>
    %214 = vector.shape_cast %213 : vector<16xf32> to vector<16x1xf32>
    %cst_117 = arith.constant 3.200000e+01 : f32
    %215 = vector.broadcast %cst_117 : f32 to vector<16x1xf32>
    %216 = arith.divf %214, %215 : vector<16x1xf32>
    %217 = vector.broadcast %207 : vector<16x1xf32> to vector<16x32xf32>
    %218 = arith.subf %201, %217 : vector<16x32xf32>
    %cst_118 = arith.constant 9.99999974E-6 : f32
    %219 = vector.broadcast %cst_118 : f32 to vector<16x1xf32>
    %220 = arith.addf %216, %219 : vector<16x1xf32>
    %221 = math.rsqrt %220 : vector<16x1xf32>
    %222 = vector.broadcast %221 : vector<16x1xf32> to vector<16x32xf32>
    %223 = arith.mulf %218, %222 : vector<16x32xf32>
    %224 = vector.broadcast %202 : vector<1x32xf32> to vector<16x32xf32>
    %225 = arith.mulf %223, %224 : vector<16x32xf32>
    %226 = vector.broadcast %203 : vector<1x32xf32> to vector<16x32xf32>
    %227 = arith.addf %225, %226 : vector<16x32xf32>
    %c0_119 = arith.constant 0 : index
    %c0_120 = arith.constant 0 : index
    %228 = vector.load %arg8[%c0_119, %c0_120] : memref<16x32xf32, #tpu.memory_space<vmem>>, vector<16x32xf32>
    tpu.vector_store %arg8[%c0_119, %c0_120], %227 {strides = array<i32>} : memref<16x32xf32, #tpu.memory_space<vmem>>, vector<16x32xf32>,
    %cst_121 = arith.constant 2.500000e-01 : f32
    %229 = vector.broadcast %cst_121 : f32 to vector<1x16xf32>
    %230 = arith.mulf %154, %229 : vector<1x16xf32>
    %c0_122 = arith.constant 0 : index
    %c0_123 = arith.constant 0 : index
    %231 = vector.load %arg9[%c0_122, %c0_123] : memref<1x16xf32, #tpu.memory_space<vmem>>, vector<1x16xf32>
    tpu.vector_store %arg9[%c0_122, %c0_123], %230 {strides = array<i32>} : memref<1x16xf32, #tpu.memory_space<vmem>>, vector<1x16xf32>,
    return
  }
  func.func @transform_0(%arg0: i32) -> (i32, i32) {
    %c0_i32 = arith.constant 0 : i32
    %c0_i32_0 = arith.constant 0 : i32
    %c0_i32_1 = arith.constant 0 : i32
    return %c0_i32, %c0_i32_0 : i32, i32
  }
  func.func @transform_1(%arg0: i32) -> (i32, i32) {
    %c0_i32 = arith.constant 0 : i32
    %c0_i32_0 = arith.constant 0 : i32
    %c0_i32_1 = arith.constant 0 : i32
    return %c0_i32, %c0_i32_0 : i32, i32
  }
  func.func @transform_2(%arg0: i32) -> (i32, i32) {
    %c0_i32 = arith.constant 0 : i32
    %c0_i32_0 = arith.constant 0 : i32
    %c0_i32_1 = arith.constant 0 : i32
    return %c0_i32, %c0_i32_0 : i32, i32
  }
  func.func @transform_3(%arg0: i32) -> (i32, i32) {
    %c0_i32 = arith.constant 0 : i32
    %c0_i32_0 = arith.constant 0 : i32
    %c0_i32_1 = arith.constant 0 : i32
    return %c0_i32, %c0_i32_0 : i32, i32
  }
  func.func @transform_4(%arg0: i32) -> (i32, i32) {
    %c0_i32 = arith.constant 0 : i32
    %c0_i32_0 = arith.constant 0 : i32
    %c0_i32_1 = arith.constant 0 : i32
    return %c0_i32, %c0_i32_0 : i32, i32
  }
  func.func @transform_5(%arg0: i32) -> (i32, i32) {
    %c0_i32 = arith.constant 0 : i32
    %c0_i32_0 = arith.constant 0 : i32
    %c0_i32_1 = arith.constant 0 : i32
    return %c0_i32, %c0_i32_0 : i32, i32
  }
  func.func @transform_6(%arg0: i32) -> (i32, i32) {
    %c0_i32 = arith.constant 0 : i32
    %c0_i32_0 = arith.constant 0 : i32
    %c0_i32_1 = arith.constant 0 : i32
    return %c0_i32, %c0_i32_0 : i32, i32
  }
  func.func @transform_7(%arg0: i32) -> (i32, i32) {
    %c0_i32 = arith.constant 0 : i32
    %c0_i32_0 = arith.constant 0 : i32
    %c0_i32_1 = arith.constant 0 : i32
    return %c0_i32, %c0_i32_0 : i32, i32
  }
  func.func @transform_8(%arg0: i32) -> (i32, i32) {
    %c0_i32 = arith.constant 0 : i32
    %c0_i32_0 = arith.constant 0 : i32
    %c0_i32_1 = arith.constant 0 : i32
    return %c0_i32, %c0_i32_0 : i32, i32
  }
}

module attributes {stable_mosaic.version = 11 : i64} {
  func.func @window_sum_kernel(%arg0: i32, %arg1: memref<2x8x8xf32, #tpu.memory_space<vmem>>, %arg2: memref<2x8x32xf32, #tpu.memory_space<vmem>>, %arg3: memref<2x1x8xf32, #tpu.memory_space<vmem>>, %arg4: memref<2x8x32xf32, #tpu.memory_space<vmem>>) attributes {dimension_semantics = [#tpu.dimension_semantics<arbitrary>], iteration_bounds = array<i64: 1>, scalar_prefetch = 0 : i64, scratch_operands = 0 : i64, tpu.core_type = #tpu.core_type<tc>, window_params = [{pipeline_mode = #tpu.pipeline_mode<synchronous>, transform_indices = @transform_0, window_bounds = array<i64: 2, 8, 8>}, {pipeline_mode = #tpu.pipeline_mode<synchronous>, transform_indices = @transform_1, window_bounds = array<i64: 2, 8, 32>}, {pipeline_mode = #tpu.pipeline_mode<synchronous>, transform_indices = @transform_2, window_bounds = array<i64: 2, 1, 8>}, {pipeline_mode = #tpu.pipeline_mode<synchronous>, transform_indices = @transform_3, window_bounds = array<i64: 2, 8, 32>}]} {
    %c0 = arith.constant 0 : index
    %c0_0 = arith.constant 0 : index
    %c0_1 = arith.constant 0 : index
    %0 = vector.load %arg1[%c0, %c0_0, %c0_1] : memref<2x8x8xf32, #tpu.memory_space<vmem>>, vector<1x8x8xf32>
    %1 = vector.shape_cast %0 : vector<1x8x8xf32> to vector<8x8xf32>
    %c0_2 = arith.constant 0 : index
    %c0_3 = arith.constant 0 : index
    %c0_4 = arith.constant 0 : index
    %2 = vector.load %arg3[%c0_2, %c0_3, %c0_4] : memref<2x1x8xf32, #tpu.memory_space<vmem>>, vector<1x1x8xf32>
    %3 = vector.shape_cast %2 : vector<1x1x8xf32> to vector<1x8xf32>
    %4 = vector.broadcast %3 : vector<1x8xf32> to vector<8x8xf32>
    %5 = arith.mulf %1, %4 : vector<8x8xf32>
    %c0_5 = arith.constant 0 : index
    %c0_6 = arith.constant 0 : index
    %c0_7 = arith.constant 0 : index
    %6 = vector.load %arg2[%c0_5, %c0_6, %c0_7] : memref<2x8x32xf32, #tpu.memory_space<vmem>>, vector<1x8x32xf32>
    %7 = vector.shape_cast %6 : vector<1x8x32xf32> to vector<8x32xf32>
    %cst = arith.constant dense<0.000000e+00> : vector<8x32xf32>
    %8 = tpu.matmul %5, %7, %cst {dimension_numbers = #tpu.dot_dimension_numbers<[1], [0], [0], [1], [0, 0, 1, 1], [], []>} : vector<8x8xf32>, vector<8x32xf32>, vector<8x32xf32> -> vector<8x32xf32>
    %c0_8 = arith.constant 0 : index
    %c0_9 = arith.constant 0 : index
    %c0_10 = arith.constant 0 : index
    %9 = vector.load %arg4[%c0_8, %c0_9, %c0_10] : memref<2x8x32xf32, #tpu.memory_space<vmem>>, vector<1x8x32xf32>
    %10 = vector.shape_cast %9 : vector<1x8x32xf32> to vector<8x32xf32>
    %11 = vector.shape_cast %8 : vector<8x32xf32> to vector<1x8x32xf32>
    tpu.vector_store %arg4[%c0_8, %c0_9, %c0_10], %11 {strides = array<i32>} : memref<2x8x32xf32, #tpu.memory_space<vmem>>, vector<1x8x32xf32>,
    %c1 = arith.constant 1 : index
    %c0_11 = arith.constant 0 : index
    %c0_12 = arith.constant 0 : index
    %12 = vector.load %arg1[%c1, %c0_11, %c0_12] : memref<2x8x8xf32, #tpu.memory_space<vmem>>, vector<1x8x8xf32>
    %13 = vector.shape_cast %12 : vector<1x8x8xf32> to vector<8x8xf32>
    %c1_13 = arith.constant 1 : index
    %c0_14 = arith.constant 0 : index
    %c0_15 = arith.constant 0 : index
    %14 = vector.load %arg3[%c1_13, %c0_14, %c0_15] : memref<2x1x8xf32, #tpu.memory_space<vmem>>, vector<1x1x8xf32>
    %15 = vector.shape_cast %14 : vector<1x1x8xf32> to vector<1x8xf32>
    %16 = vector.broadcast %15 : vector<1x8xf32> to vector<8x8xf32>
    %17 = arith.mulf %13, %16 : vector<8x8xf32>
    %c1_16 = arith.constant 1 : index
    %c0_17 = arith.constant 0 : index
    %c0_18 = arith.constant 0 : index
    %18 = vector.load %arg2[%c1_16, %c0_17, %c0_18] : memref<2x8x32xf32, #tpu.memory_space<vmem>>, vector<1x8x32xf32>
    %19 = vector.shape_cast %18 : vector<1x8x32xf32> to vector<8x32xf32>
    %cst_19 = arith.constant dense<0.000000e+00> : vector<8x32xf32>
    %20 = tpu.matmul %17, %19, %cst_19 {dimension_numbers = #tpu.dot_dimension_numbers<[1], [0], [0], [1], [0, 0, 1, 1], [], []>} : vector<8x8xf32>, vector<8x32xf32>, vector<8x32xf32> -> vector<8x32xf32>
    %c1_20 = arith.constant 1 : index
    %c0_21 = arith.constant 0 : index
    %c0_22 = arith.constant 0 : index
    %21 = vector.load %arg4[%c1_20, %c0_21, %c0_22] : memref<2x8x32xf32, #tpu.memory_space<vmem>>, vector<1x8x32xf32>
    %22 = vector.shape_cast %21 : vector<1x8x32xf32> to vector<8x32xf32>
    %23 = vector.shape_cast %20 : vector<8x32xf32> to vector<1x8x32xf32>
    tpu.vector_store %arg4[%c1_20, %c0_21, %c0_22], %23 {strides = array<i32>} : memref<2x8x32xf32, #tpu.memory_space<vmem>>, vector<1x8x32xf32>,
    return
  }
  func.func @transform_0(%arg0: i32) -> (i32, i32, i32) {
    %c0_i32 = arith.constant 0 : i32
    %c0_i32_0 = arith.constant 0 : i32
    %c0_i32_1 = arith.constant 0 : i32
    %c0_i32_2 = arith.constant 0 : i32
    return %c0_i32, %c0_i32_0, %c0_i32_1 : i32, i32, i32
  }
  func.func @transform_1(%arg0: i32) -> (i32, i32, i32) {
    %c0_i32 = arith.constant 0 : i32
    %c0_i32_0 = arith.constant 0 : i32
    %c0_i32_1 = arith.constant 0 : i32
    %c0_i32_2 = arith.constant 0 : i32
    return %c0_i32, %c0_i32_0, %c0_i32_1 : i32, i32, i32
  }
  func.func @transform_2(%arg0: i32) -> (i32, i32, i32) {
    %c0_i32 = arith.constant 0 : i32
    %c0_i32_0 = arith.constant 0 : i32
    %c0_i32_1 = arith.constant 0 : i32
    %c0_i32_2 = arith.constant 0 : i32
    return %c0_i32, %c0_i32_0, %c0_i32_1 : i32, i32, i32
  }
  func.func @transform_3(%arg0: i32) -> (i32, i32, i32) {
    %c0_i32 = arith.constant 0 : i32
    %c0_i32_0 = arith.constant 0 : i32
    %c0_i32_1 = arith.constant 0 : i32
    %c0_i32_2 = arith.constant 0 : i32
    return %c0_i32, %c0_i32_0, %c0_i32_1 : i32, i32, i32
  }
}

</mosaic_0001>

<bundles_post_ra>
// kernel: modified_dw_block_core.5
= control target key start
LH: loop header
LB: loop body
LE: loop exit
PB: predicated region body
PF: predicated region fallthrough
CT: control target
= control target key end

     0   :  { %vm22_vm0 = vcmask 64512   ;;  %s181_s0 = inlined_call_operand.vmem [shape: f32[2,8,8], index: 0, kind: input, shape index: {}]   ;;  %s182_s1 = inlined_call_operand.vmem [shape: f32[2,8,32], index: 1, kind: input, shape index: {}]   ;;  %s183_s2 = inlined_call_operand.vmem [shape: f32[2,1,8], index: 2, kind: input, shape index: {}]   ;;  %s184_s3 = inlined_call_operand.hbm [shape: f32[2,8,32], index: 3, kind: output, shape index: {}]  }
   0x1   :  { %v21_v0 = vld [vmem:[%s182_s1] sm:$0xff]  ;;  %v104_v1 = vld [vmem:[%s182_s1 + $0x8] sm:$0xff] }
   0x2   :  { %v15_v2 = vld [vmem:[%s181_s0] sm:$0xff]  ;;  %41 = vmatpush.msra.mxu0 %v21_v0  ;;  %76 = vmatpush.msra.mxu1 %v104_v1  ;;  %v102_v4 = vld [vmem:[%s181_s0 + $0x8] sm:$0xff] }
   0x3   :  { %v109_v3 = vld [vmem:[%s183_s2] ss:$0 sm:$0xff]  ;;  %v110_v5 = vld [vmem:[%s183_s2 + $0x1] ss:$0 sm:$0xff] }
   0x4   :  { %8 = vsyncpa [#allocation3], 0  ;;  %v20_v6 = vmul.f32 %v109_v3, %v15_v2  ;;  %v55_v7 = vmul.f32 %v110_v5, %v102_v4  ;;  %s137_s1 = smov [#allocation2]   ;;  %s89_s27 = sshll.u32 %s184_s3, 4  ;;  %vm46_vm1 = vcmask 261120   ;;  %s90_s27 = int_to_ptr.hbm [resolvable:$true] %s89_s27 }
   0x5   :  { %s87_s24 = sshll.u32 %s137_s1, 4  ;;  %s138_s0 = smov 128   ;;  %s88_s24 = int_to_ptr.vmem [resolvable:$true] %s87_s24 }
   0x6   :  { %101 = vmatmul.msk.f32.vlgmr.msra.gmra.mxu0 %vm22_vm0, %v20_v6  ;;  %105 = vmatmul.msk.f32.vlgmr.msra.gmra.mxu1 %vm22_vm0, %v55_v7  ;;  %s139_s2 = smov 8  }
  0x83   :  { %v43_v8 = vpop.f32.mrf.mxu0  ;;  %v78_v9 = vpop.f32.mrf.mxu1 }
  0x84   :  { %47 = vst.msk [vmem:[#allocation2] sm:$0xff] %vm46_vm1, %v43_v8 }
  0x85   :  { %82 = vst.msk [vmem:[#allocation2 + $0x8] sm:$0xff] %vm46_vm1, %v78_v9 }
  0x86   :  { %95 = dma.vmem_to_hbm [thread:$0]  %s88_s24, 256, %s90_s27, [#allocation3], %s138_s0, %s138_s0, %s139_s2  }
  0x87   :  { %135 = dma.done.wait [#allocation3], 256  }
  0x88   :  { %136 = vsyncadd [#allocation3], 4294967040 }
  0x89   :  { %100 = vsyncpa [#allocation3], 1 }

// kernel: modified_dw_block_core.3
= control target key start
LH: loop header
LB: loop body
LE: loop exit
PB: predicated region body
PF: predicated region fallthrough
CT: control target
= control target key end

     0   :  { %s1624_s9 = smov 96   ;;  %vm56_vm0 = vcmask 261120   ;;  %s1625_s18 = smov 64   ;;  %v1628_v16 = vmov 0   ;;  %vm164_vm1 = vcmask 64512   ;;  %vm204_vm3 = vcmask 130048   ;;  %s2104_s3 = inlined_call_operand.vmem [shape: f32[32,128], index: 3, kind: input, shape index: {}]   ;;  %s2105_s6 = inlined_call_operand.vmem [shape: f32[16,64], index: 6, kind: input, shape index: {}]   ;;  %s2106_s0 = inlined_call_operand.vmem [shape: f32[16,32], index: 0, kind: input, shape index: {}]   ;;  %s2107_s2 = inlined_call_operand.vmem [shape: f32[1,16], index: 2, kind: input, shape index: {}]   ;;  %s2108_s1 = inlined_call_operand.vmem [shape: f32[16,1], index: 1, kind: input, shape index: {}]   ;;  %s2109_s8 = inlined_call_operand.vmem [shape: f32[1,16], index: 8, kind: output, shape index: {1}]   ;;  %s2110_s4 = inlined_call_operand.vmem [shape: f32[32,64], index: 4, kind: input, shape index: {}]   ;;  %s2111_s5 = inlined_call_operand.vmem [shape: f32[64,32], index: 5, kind: input, shape index: {}]   ;;  %s2112_s7 = inlined_call_operand.vmem [shape: f32[16,32], index: 7, kind: output, shape index: {0}]  }
   0x1   :  { %v1687_v0 = vld [vmem:[%s2104_s3 + $0x10] sm:$0xff]  ;;  %v53_v1 = vld [vmem:[%s2104_s3 + $0x18] sm:$0xff]  ;;  %v1699_v3 = vld [vmem:[%s2104_s3] sm:$0xff]  ;;  %s1626_s19 = smov 120   ;;  %s1627_s20 = smov 88   ;;  %1488 = vset.pattern.permute.xlu1 %v1628_v16  ;;  %1494 = vset.pattern.permute.xlu0 %v1628_v16 }
   0x2   :  { %v1693_v2 = vpack.i.bf16 %v1687_v0, %v53_v1  ;;  %75 = vmatpush.msra.mxu0 %v53_v1  ;;  %1430 = vmatpush.msra.mxu2 %v53_v1  ;;  %v1704_v4 = vld [vmem:[%s2104_s3 + $0x8] sm:$0xff]  ;;  %v1725_v7 = vld [vmem:[%s2106_s0] sm:$0xff]  ;;  %v1629_v49 = vmov -1e+30   ;;  %s1631_s10 = smov 112   ;;  %s1632_s11 = smov 80  }
   0x3   :  { %v1712_v5 = vpack.i.bf16 %v1699_v3, %v1704_v4  ;;  %v1720_v6 = vld [vmem:[%s2106_s0 + $0x8] sm:$0xff]  ;;  %v30_v14 = vld [vmem:[%s2108_s1] sm:$0xff]  ;;  %s1633_s12 = smov 32   ;;  %s1634_s13 = smov 48  }
   0x4   :  { %1454 = vrot.lane.b32.xlu0 %v1693_v2, %s1624_s9  ;;  %76 = vmatpush.msra.mxu0 %v1687_v0  ;;  %v31_v15 = vld [vmem:[%s2108_s1 + $0x8] sm:$0xff]  ;;  %v1752_v20 = vld [vmem:[%s2105_s6 + $0x1] ss:$0 sm:$0xff]  ;;  %v1758_v24 = vld [vmem:[%s2105_s6] ss:$0 sm:$0xff]  ;;  %s1635_s14 = smov 72  }
   0x5   :  { %1431 = vmatpush.msra.mxu2 %v1687_v0  ;;  %1464 = vrot.lane.b32.xlu1 %v1693_v2, %s1625_s18  ;;  %v1567_v42 = vld [vmem:[%s2107_s2] ss:$0 sm:$0xff]  ;;  %s1636_s15 = smov 104  }
   0x6   :  { %77 = vmatpush.msra.mxu0 %v1704_v4  ;;  %1474 = vrot.lane.b32.xlu2 %v1693_v2, %s1627_s20 }
   0x7   :  { %1432 = vmatpush.msra.mxu2 %v1704_v4 }
   0x8   :  { %78 = vmatpush.msra.mxu0 %v1699_v3 }
   0x9   :  { %1433 = vmatpush.msra.mxu2 %v1699_v3  ;;  %1370 = vmatmul.msk.f32.vlgmr.msra.gmra.mxu0 %vm56_vm0, %v1725_v7 }
   0xa   :  { %1371 = vmatmul.msk.f32.vlgmr.msra.gmra.mxu2 %vm56_vm0, %v1720_v6 }
   0xc   :  { %1459 = vrot.lane.b32.xlu0 %v1712_v5, %s1624_s9  ;;  %s1630_s9 = smov 56  }
   0xd   :  { %1469 = vrot.lane.b32.xlu1 %v1712_v5, %s1625_s18 }
   0xe   :  { %1479 = vrot.lane.b32.xlu2 %v1712_v5, %s1627_s20  ;;  %s1637_s20 = smov 40  }
  0x14   :  { %1484 = vrot.lane.b32.xlu0 %v1693_v2, %s1626_s19 }
  0x15   :  { %35 = vperm.xlu1 %1488, %v30_v14  }
  0x16   :  { %1490 = vrot.lane.b32.xlu2 %v1712_v5, %s1626_s19 }
  0x1c   :  { %40 = vperm.xlu0 %1494, %v31_v15   ;;  %v1810_v15 = vld [vmem:[%s2105_s6 + $0x2] ss:$0 sm:$0xff] }
  0x60   :  { %v1475_v36 = vpop.permute.xlu2 %1474 }
  0x61   :  { %v1477_v37 = vunpack.i.h.bf16 %v1475_v36  ;;  %v1476_v38 = vunpack.i.l.bf16 %v1475_v36 }
  0x68   :  { %v1480_v39 = vpop.permute.xlu2 %1479 }
  0x69   :  { %v1482_v40 = vunpack.i.h.bf16 %v1480_v39  ;;  %v1481_v41 = vunpack.i.l.bf16 %v1480_v39 }
  0x70   :  { %v1491_v45 = vpop.permute.xlu2 %1490 }
  0x71   :  { %v1492_v46 = vunpack.i.l.bf16 %v1491_v45  ;;  %v1493_v47 = vunpack.i.h.bf16 %v1491_v45 }
  0x76   :  { %v1455_v8 = vpop.permute.xlu0 %1454 }
  0x77   :  { %v1456_v9 = vunpack.i.l.bf16 %v1455_v8  ;;  %v1457_v10 = vunpack.i.h.bf16 %v1455_v8  ;;  %v1465_v17 = vpop.permute.xlu1 %1464 }
  0x78   :  { %v1466_v18 = vunpack.i.l.bf16 %v1465_v17  ;;  %v1467_v19 = vunpack.i.h.bf16 %v1465_v17 }
  0x79   :  { %116 = vmatpush.msra.mxu1 %v1456_v9  ;;  %1434 = vmatpush.msra.mxu3 %v1456_v9 }
  0x7a   :  { %153 = vmatpush.msrb.mxu2 %v1466_v18 }
  0x7b   :  { %117 = vmatpush.msra.mxu1 %v1457_v10  ;;  %1435 = vmatpush.msra.mxu3 %v1457_v10 }
  0x7c   :  { %154 = vmatpush.msrb.mxu2 %v1467_v19 }
  0x7e   :  { %v1460_v11 = vpop.permute.xlu0 %1459 }
  0x7f   :  { %v1461_v12 = vunpack.i.l.bf16 %v1460_v11  ;;  %v1462_v13 = vunpack.i.h.bf16 %v1460_v11  ;;  %v1470_v25 = vpop.permute.xlu1 %1469 }
  0x80   :  { %v1471_v28 = vunpack.i.l.bf16 %v1470_v25  ;;  %v1472_v29 = vunpack.i.h.bf16 %v1470_v25 }
  0x81   :  { %118 = vmatpush.msra.mxu1 %v1461_v12  ;;  %1436 = vmatpush.msra.mxu3 %v1461_v12 }
  0x82   :  { %155 = vmatpush.msrb.mxu2 %v1471_v28 }
  0x83   :  { %119 = vmatpush.msra.mxu1 %v1462_v13  ;;  %1437 = vmatpush.msra.mxu3 %v1462_v13 }
  0x84   :  { %1373 = vmatmul.msk.f32.vlgmr.msra.gmra.mxu3 %vm56_vm0, %v1720_v6  ;;  %1372 = vmatmul.msk.f32.vlgmr.msra.gmra.mxu1 %vm56_vm0, %v1725_v7 }
  0x85   :  { %156 = vmatpush.msrb.mxu2 %v1472_v29 }
  0x86   :  { %v80_v27 = vpop.f32.mrf.mxu0  ;;  %1374 = vmatmul.msk.f32.vlgmr.msrb.gmra.mxu2 %vm56_vm0, %v1725_v7  ;;  %v1485_v33 = vpop.permute.xlu0 %1484 }
  0x87   :  { %v81_v30 = vadd.f32 %v1758_v24, %v80_v27  ;;  %v1486_v34 = vunpack.i.l.bf16 %v1485_v33  ;;  %v1487_v35 = vunpack.i.h.bf16 %v1485_v33  ;;  %362 = vmatpush.msra.mxu2 %v1476_v38  ;;  %v36_v43 = vpop.permute.xlu1 %35 }
  0x88   :  { %vm1776_vm2 = vcmp.eq.f32.partialorder %v36_v43, %v1567_v42 }
  0x89   :  { %323 = vmatpush.msrb.mxu1 %v1486_v34  ;;  %363 = vmatpush.msra.mxu2 %v1477_v37  ;;  %v1782_v50 = vsel %vm1776_vm2, 0.0, %v1629_v49 }
  0x8b   :  { %324 = vmatpush.msrb.mxu1 %v1487_v35  ;;  %364 = vmatpush.msra.mxu2 %v1481_v41 }
  0x8d   :  { %v83_v31 = vpop.f32.mrf.mxu2  ;;  %365 = vmatpush.msra.mxu2 %v1482_v40  ;;  %325 = vmatpush.msrb.mxu1 %v1492_v46 }
  0x8e   :  { %v84_v32 = vadd.f32 %v1758_v24, %v83_v31  ;;  %1375 = vmatmul.msk.f32.gmra.mxu2 %vm56_vm0, %v1720_v6  ;;  %v41_v52 = vpop.permute.xlu0 %40 }
  0x8f   :  { %326 = vmatpush.msrb.mxu1 %v1493_v47  ;;  %vm1790_vm4 = vcmp.eq.f32.partialorder %v41_v52, %v1567_v42 }
  0x90   :  { %1382 = vmatmul.msk.f32.vlgmr.msrb.gmra.mxu1 %vm56_vm0, %v1725_v7  ;;  %v1796_v57 = vsel %vm1790_vm4, 0.0, %v1629_v49 }
  0x96   :  { %1384 = vmatmul.msk.f32.vlgmr.msra.gmra.mxu2 %vm56_vm0, %v1725_v7 }
  0x98   :  { %1383 = vmatmul.msk.f32.gmra.mxu1 %vm56_vm0, %v1720_v6 }
  0x9e   :  { %1385 = vmatmul.msk.f32.gmra.mxu2 %vm56_vm0, %v1720_v6 }
 0x101   :  { %v121_v22 = vpop.f32.mrf.mxu1 }
 0x102   :  { %v122_v26 = vadd.f32 %v1752_v20, %v121_v22 }
 0x107   :  { %v124_v21 = vpop.f32.mrf.mxu3 }
 0x108   :  { %v125_v23 = vadd.f32 %v1752_v20, %v124_v21 }
 0x109   :  { %v158_v13 = vpop.f32.mrf.mxu2 }
 0x10a   :  { %1376 = vmatpush.xpose.msk.msrb.mxu3 %vm164_vm1, %v125_v23  ;;  %v159_v19 = vadd.f32 %v1810_v15, %v158_v13 }
 0x10e   :  { %1377 = vmatpush.xpose.msk.msrb.mxu3 %vm164_vm1, %v122_v26 }
 0x111   :  { %1378 = vmatmul.msk.f32.vlgmr.msrb.gmra.mxu3 %vm164_vm1, %v81_v30  ;;  %v161_v18 = vpop.f32.mrf.mxu2 }
 0x112   :  { %v162_v21 = vadd.f32 %v1810_v15, %v161_v18 }
 0x114   :  { %285 = vmatpush.msrb.mxu0 %v162_v21 }
 0x116   :  { %286 = vmatpush.msrb.mxu0 %v159_v19 }
 0x119   :  { %1379 = vmatmul.msk.f32.gmra.mxu3 %vm164_vm1, %v84_v32  ;;  %v367_v22 = vpop.f32.mrf.mxu2 }
 0x121   :  { %v370_v23 = vpop.f32.mrf.mxu2 }
 0x194   :  { %v194_v48 = vpop.f32.mrf.mxu3 }
 0x195   :  { %v200_v51 = vmul.f32 0.35355338, %v194_v48 }
 0x197   :  { %v202_v53 = vadd.f32 %v200_v51, %v1782_v50 }
 0x199   :  { %v205_v54 = vsel %vm204_vm3, %v202_v53, -inf }
 0x19a   :  { %206 = vmax.xlane.f32.xlu1 %v205_v54 }
 0x19c   :  { %v197_v56 = vpop.f32.mrf.mxu3 }
 0x19d   :  { %v201_v58 = vmul.f32 0.35355338, %v197_v56 }
 0x19f   :  { %v203_v59 = vadd.f32 %v201_v58, %v1796_v57  ;;  %v328_v58 = vpop.f32.mrf.mxu1 }
 0x1a1   :  { %v208_v60 = vsel %vm204_vm3, %v203_v59, -inf }
 0x1a2   :  { %209 = vmax.xlane.f32.xlu2 %v208_v60 }
 0x1b3   :  { %347 = vrot.lane.b32.xlu1 %v1752_v20, %s1626_s19 }
 0x1bb   :  { %1501 = vrot.lane.b32.xlu1 %v1712_v5, %s1630_s9 }
 0x20d   :  { %v207_v61 = vpop.xlane.xlu1 %206 }
 0x20e   :  { %v211_v62 = vsub.f32 %v202_v53, %v207_v61 }
 0x210   :  { %v213_v63 = vmul.f32 1.442695, %v211_v62  ;;  %v331_v62 = vpop.f32.mrf.mxu1 }
 0x212   :  { %1576 = vpow2.f32 %v213_v63 }
 0x215   :  { %v210_v1 = vpop.xlane.xlu2 %209 }
 0x216   :  { %v212_v8 = vsub.f32 %v203_v59, %v210_v1 }
 0x218   :  { %v1577_v9 = vpop.eup %1576  ;;  %v215_v10 = vmul.f32 1.442695, %v212_v8 }
 0x219   :  { %v217_v11 = vsel %vm1776_vm2, %v1577_v9, 0.0 }
 0x21a   :  { %1578 = vpow2.f32 %v215_v10  ;;  %v219_v12 = vsel %vm204_vm3, %v217_v11, 0.0 }
 0x21b   :  { %220 = vadd.xlane.f32.xlu0 %v219_v12 }
 0x220   :  { %v1579_v14 = vpop.eup %1578 }
 0x221   :  { %v218_v16 = vsel %vm1790_vm4, %v1579_v14, 0.0 }
 0x222   :  { %v222_v17 = vsel %vm204_vm3, %v218_v16, 0.0 }
 0x223   :  { %223 = vadd.xlane.f32.xlu2 %v222_v17 }
 0x225   :  { %v348_v25 = vpop.permute.xlu1 %347 }
 0x226   :  { %v371_v26 = vadd.f32 %v370_v23, %v348_v25  ;;  %v368_v27 = vadd.f32 %v367_v22, %v348_v25 }
 0x228   :  { %1388 = vmatpush.xpose.msk.msra.mxu0 %vm164_vm1, %v371_v26 }
 0x22c   :  { %1389 = vmatpush.xpose.msk.msra.mxu0 %vm164_vm1, %v368_v27 }
 0x22d   :  { %v1502_v8 = vpop.permute.xlu1 %1501 }
 0x22e   :  { %v1503_v12 = vunpack.i.l.bf16 %v1502_v8  ;;  %v1504_v13 = vunpack.i.h.bf16 %v1502_v8 }
 0x22f   :  { %1496 = vrot.lane.b32.xlu0 %v1693_v2, %s1630_s9 }
 0x23b   :  { %308 = vrot.lane.b32.xlu2 %v1758_v24, %s1626_s19 }
 0x28e   :  { %v221_v28 = vpop.xlane.xlu0 %220 }
 0x28f   :  { %1580 = vrcp.f32 %v221_v28  ;;  %v236_v33 = vand.u32 2147483648, %v221_v28  ;;  %v234_v35 = vand.u32 2147483647, %v221_v28  ;;  %vm230_vm6 = vweird.f32 %v221_v28 }
 0x291   :  { %v237_v38 = vor.u32 1.1754944e-38, %v236_v33  ;;  %vm235_vm8 = vcmp.eq.f32.partialorder %v234_v35, 8.507059e+37 }
 0x295   :  { %v1581_v29 = vpop.eup %1580 }
 0x296   :  { %v226_v30 = vmul.f32 %v1581_v29, %v221_v28  ;;  %v224_v31 = vpop.xlane.xlu2 %223  ;;  %vm231_vm5 = vweird.f32 %v1581_v29 }
 0x297   :  { %1582 = vrcp.f32 %v224_v31  ;;  %vm232_vm7 = vmor %vm230_vm6, %vm231_vm5  ;;  %v251_v45 = vand.u32 2147483648, %v224_v31  ;;  %v249_v47 = vand.u32 2147483647, %v224_v31  ;;  %vm245_vm10 = vweird.f32 %v224_v31 }
 0x298   :  { %v227_v32 = vsub.f32 1.0, %v226_v30 }
 0x299   :  { %v252_v49 = vor.u32 1.1754944e-38, %v251_v45  ;;  %vm250_vm12 = vcmp.eq.f32.partialorder %v249_v47, 8.507059e+37 }
 0x29a   :  { %v228_v34 = vmul.f32 %v1581_v29, %v227_v32 }
 0x29c   :  { %v229_v36 = vadd.f32 %v1581_v29, %v228_v34 }
 0x29d   :  { %v1583_v37 = vpop.eup %1582 }
 0x29e   :  { %v241_v39 = vmul.f32 %v1583_v37, %v224_v31  ;;  %v233_v40 = vsel %vm232_vm7, %v1581_v29, %v229_v36  ;;  %vm246_vm9 = vweird.f32 %v1583_v37  ;;  %v309_v60 = vpop.permute.xlu2 %308 }
 0x29f   :  { %v238_v41 = vsel %vm235_vm8, %v237_v38, %v233_v40  ;;  %vm247_vm11 = vmor %vm245_vm10, %vm246_vm9  ;;  %v329_v61 = vadd.f32 %v328_v58, %v309_v60  ;;  %v332_v63 = vadd.f32 %v331_v62, %v309_v60 }
 0x2a0   :  { %v242_v42 = vsub.f32 1.0, %v241_v39  ;;  %v239_v43 = vmul.f32 %v238_v41, %v217_v11 }
 0x2a1   :  { %v1497_v1 = vpop.permute.xlu0 %1496 }
 0x2a2   :  { %v243_v46 = vmul.f32 %v1583_v37, %v242_v42  ;;  %1380 = vmatmul.msk.f32.vlgmr.msrb.gmra.mxu0 %vm204_vm3, %v239_v43  ;;  %v255_v54 = vsel %vm204_vm3, %v239_v43, 0.0  ;;  %v1499_v9 = vunpack.i.h.bf16 %v1497_v1  ;;  %v1498_v10 = vunpack.i.l.bf16 %v1497_v1 }
 0x2a4   :  { %v244_v48 = vadd.f32 %v1583_v37, %v243_v46  ;;  %401 = vmatpush.msra.mxu3 %v1498_v10 }
 0x2a6   :  { %v248_v51 = vsel %vm247_vm11, %v1583_v37, %v244_v48  ;;  %402 = vmatpush.msra.mxu3 %v1499_v9 }
 0x2a7   :  { %v253_v52 = vsel %vm250_vm12, %v252_v49, %v248_v51 }
 0x2a8   :  { %v254_v53 = vmul.f32 %v253_v52, %v218_v16  ;;  %403 = vmatpush.msra.mxu3 %v1503_v12 }
 0x2aa   :  { %v256_v56 = vsel %vm204_vm3, %v254_v53, 0.0  ;;  %1381 = vmatmul.msk.f32.gmra.mxu0 %vm204_vm3, %v254_v53  ;;  %404 = vmatpush.msra.mxu3 %v1504_v13 }
 0x2ab   :  { %v1827_v59 = vadd.f32 %v256_v56, %v255_v54  ;;  %1386 = vmatmul.msk.f32.vlgmr.msra.gmra.mxu3 %vm56_vm0, %v1725_v7 }
 0x2ad   :  { %v258_v13 = vrot.slane %v1827_v59, 4 }
 0x2b2   :  { %1390 = vmatmul.msk.f32.vlgmr.msra.gmra.mxu0 %vm164_vm1, %v329_v61 }
 0x2b3   :  { %1387 = vmatmul.msk.f32.gmra.mxu3 %vm56_vm0, %v1720_v6 }
 0x2ba   :  { %1391 = vmatmul.msk.f32.gmra.mxu0 %vm164_vm1, %v332_v63 }
 0x31f   :  { %v1831_v11 = vpop.f32.mrf.mxu0 }
 0x327   :  { %v1833_v14 = vpop.f32.mrf.mxu0 }
 0x32e   :  { %v406_v38 = vpop.f32.mrf.mxu3 }
 0x32f   :  { %v441_v16 = vpop.f32.mrf.mxu0 }
 0x330   :  { %v447_v17 = vmul.f32 0.35355338, %v441_v16 }
 0x332   :  { %v449_v18 = vadd.f32 %v447_v17, %v1782_v50 }
 0x334   :  { %v451_v19 = vsel %vm204_vm3, %v449_v18, -inf }
 0x335   :  { %452 = vmax.xlane.f32.xlu2 %v451_v19 }
 0x336   :  { %v409_v39 = vpop.f32.mrf.mxu3 }
 0x337   :  { %v444_v21 = vpop.f32.mrf.mxu0 }
 0x338   :  { %v448_v22 = vmul.f32 0.35355338, %v444_v21 }
 0x33a   :  { %v450_v23 = vadd.f32 %v448_v22, %v1796_v57  ;;  %v259_v22 = vadd.f32 %v258_v13, %v1827_v59 }
 0x33c   :  { %v454_v25 = vsel %vm204_vm3, %v450_v23, -inf  ;;  %v260_v59 = vrot.slane %v259_v22, 2 }
 0x33d   :  { %455 = vmax.xlane.f32.xlu1 %v454_v25 }
 0x356   :  { %386 = vrot.lane.b32.xlu1 %v1810_v15, %s1626_s19 }
 0x35e   :  { %1521 = vrot.lane.b32.xlu1 %v1712_v5, %s1631_s10 }
 0x366   :  { %619 = vrot.lane.b32.xlu1 %v1758_v24, %s1631_s10 }
 0x36e   :  { %1531 = vrot.lane.b32.xlu1 %v1712_v5, %s1634_s13 }
 0x376   :  { %1541 = vrot.lane.b32.xlu1 %v1712_v5, %s1635_s14 }
 0x3a8   :  { %v453_v26 = vpop.xlane.xlu2 %452 }
 0x3a9   :  { %v457_v27 = vsub.f32 %v449_v18, %v453_v26 }
 0x3ab   :  { %v459_v28 = vmul.f32 1.442695, %v457_v27 }
 0x3ad   :  { %1584 = vpow2.f32 %v459_v28 }
 0x3b0   :  { %v456_v29 = vpop.xlane.xlu1 %455 }
 0x3b1   :  { %v458_v30 = vsub.f32 %v450_v23, %v456_v29 }
 0x3b3   :  { %v1585_v31 = vpop.eup %1584  ;;  %v461_v32 = vmul.f32 1.442695, %v458_v30 }
 0x3b4   :  { %v463_v33 = vsel %vm1776_vm2, %v1585_v31, 0.0 }
 0x3b5   :  { %1586 = vpow2.f32 %v461_v32  ;;  %v465_v34 = vsel %vm204_vm3, %v463_v33, 0.0 }
 0x3b6   :  { %466 = vadd.xlane.f32.xlu0 %v465_v34 }
 0x3bb   :  { %v1587_v35 = vpop.eup %1586 }
 0x3bc   :  { %v1854_v36 = vsel %vm1790_vm4, %v1587_v35, 0.0 }
 0x3bd   :  { %v468_v37 = vsel %vm204_vm3, %v1854_v36, 0.0 }
 0x3be   :  { %469 = vadd.xlane.f32.xlu2 %v468_v37  ;;  %v261_v37 = vadd.f32 %v260_v59, %v259_v22 }
 0x3c8   :  { %v387_v40 = vpop.permute.xlu1 %386 }
 0x3c9   :  { %v410_v41 = vadd.f32 %v409_v39, %v387_v40  ;;  %v407_v42 = vadd.f32 %v406_v38, %v387_v40  ;;  %v262_v40 = vrot.slane %v261_v37, 1 }
 0x3ca   :  { %1506 = vrot.lane.b32.xlu0 %v1693_v2, %s1632_s11 }
 0x3cb   :  { %531 = vmatpush.msra.mxu1 %v410_v41 }
 0x3cd   :  { %532 = vmatpush.msra.mxu1 %v407_v42 }
 0x3d0   :  { %v1522_v28 = vpop.permute.xlu1 %1521 }
 0x3d1   :  { %v1523_v34 = vunpack.i.l.bf16 %v1522_v28 }
 0x3d2   :  { %1516 = vrot.lane.b32.xlu0 %v1693_v2, %s1631_s10 }
 0x3d6   :  { %1511 = vrot.lane.b32.xlu2 %v1712_v5, %s1632_s11 }
 0x3da   :  { %657 = vrot.lane.b32.xlu0 %v1752_v20, %s1631_s10 }
 0x3de   :  { %575 = vrot.lane.b32.xlu2 %v1699_v3, %s1633_s12 }
 0x3e2   :  { %1526 = vrot.lane.b32.xlu0 %v1693_v2, %s1634_s13 }
 0x3e6   :  { %542 = vrot.lane.b32.xlu2 %v1704_v4, %s1633_s12 }
 0x429   :  { %v467_v43 = vpop.xlane.xlu0 %466 }
 0x42a   :  { %1588 = vrcp.f32 %v467_v43  ;;  %v482_v49 = vand.u32 2147483648, %v467_v43  ;;  %v480_v3 = vand.u32 2147483647, %v467_v43  ;;  %vm476_vm14 = vweird.f32 %v467_v43 }
 0x42c   :  { %v483_v53 = vor.u32 1.1754944e-38, %v482_v49  ;;  %vm481_vm5 = vcmp.eq.f32.partialorder %v480_v3, 8.507059e+37 }
 0x430   :  { %v1589_v45 = vpop.eup %1588 }
 0x431   :  { %v472_v46 = vmul.f32 %v1589_v45, %v467_v43  ;;  %v470_v47 = vpop.xlane.xlu2 %469  ;;  %vm477_vm13 = vweird.f32 %v1589_v45  ;;  %v263_v43 = vadd.f32 %v262_v40, %v261_v37 }
 0x432   :  { %1590 = vrcp.f32 %v470_v47  ;;  %vm478_vm15 = vmor %vm476_vm14, %vm477_vm13  ;;  %v497_v63 = vand.u32 2147483648, %v470_v47  ;;  %v495_v8 = vand.u32 2147483647, %v470_v47  ;;  %vm491_vm7 = vweird.f32 %v470_v47 }
 0x433   :  { %v473_v48 = vsub.f32 1.0, %v472_v46 }
 0x434   :  { %v498_v18 = vor.u32 1.1754944e-38, %v497_v63  ;;  %vm496_vm9 = vcmp.eq.f32.partialorder %v495_v8, 8.507059e+37 }
 0x435   :  { %v474_v51 = vmul.f32 %v1589_v45, %v473_v48 }
 0x437   :  { %v475_v52 = vadd.f32 %v1589_v45, %v474_v51 }
 0x438   :  { %v1591_v4 = vpop.eup %1590 }
 0x439   :  { %v479_v54 = vsel %vm478_vm15, %v1589_v45, %v475_v52  ;;  %v487_v56 = vmul.f32 %v1591_v4, %v470_v47  ;;  %v1512_v58 = vpop.permute.xlu2 %1511  ;;  %vm492_vm6 = vweird.f32 %v1591_v4 }
 0x43a   :  { %v484_v60 = vsel %vm481_vm5, %v483_v53, %v479_v54  ;;  %v1513_v16 = vunpack.i.l.bf16 %v1512_v58  ;;  %vm493_vm8 = vmor %vm491_vm7, %vm492_vm6  ;;  %v1514_v23 = vunpack.i.h.bf16 %v1512_v58 }
 0x43b   :  { %v488_v61 = vsub.f32 1.0, %v487_v56  ;;  %v485_v62 = vmul.f32 %v484_v60, %v463_v33 }
 0x43c   :  { %v1507_v1 = vpop.permute.xlu0 %1506 }
 0x43d   :  { %v489_v9 = vmul.f32 %v1591_v4, %v488_v61  ;;  %1392 = vmatmul.msk.f32.vlgmr.msra.gmra.mxu1 %vm204_vm3, %v485_v62  ;;  %v1509_v10 = vunpack.i.h.bf16 %v1507_v1  ;;  %v1508_v12 = vunpack.i.l.bf16 %v1507_v1  ;;  %v501_v29 = vsel %vm204_vm3, %v485_v62, 0.0 }
 0x43f   :  { %672 = vmatpush.msrb.mxu1 %v1508_v12  ;;  %v490_v17 = vadd.f32 %v1591_v4, %v489_v9 }
 0x441   :  { %v576_v19 = vpop.permute.xlu2 %575  ;;  %v494_v21 = vsel %vm493_vm8, %v1591_v4, %v490_v17  ;;  %673 = vmatpush.msrb.mxu1 %v1509_v10  ;;  %v620_v4 = vpop.permute.xlu1 %619 }
 0x442   :  { %599 = vmatpush.msrb.mxu3 %v576_v19  ;;  %v499_v25 = vsel %vm496_vm9, %v498_v18, %v494_v21 }
 0x443   :  { %1396 = vmatmul.msk.f32.vlgmr.msrb.gmra.mxu3 %vm164_vm1, %v1831_v11  ;;  %v500_v26 = vmul.f32 %v499_v25, %v1854_v36  ;;  %674 = vmatpush.msrb.mxu1 %v1513_v16  ;;  %v1524_v11 = vunpack.i.h.bf16 %v1522_v28 }
 0x444   :  { %v1517_v27 = vpop.permute.xlu0 %1516 }
 0x445   :  { %v502_v30 = vsel %vm204_vm3, %v500_v26, 0.0  ;;  %1393 = vmatmul.msk.f32.gmra.mxu1 %vm204_vm3, %v500_v26  ;;  %v1519_v31 = vunpack.i.h.bf16 %v1517_v27  ;;  %v1518_v32 = vunpack.i.l.bf16 %v1517_v27 }
 0x446   :  { %v503_v33 = vadd.f32 %v502_v30, %v501_v29  ;;  %675 = vmatpush.msrb.mxu1 %v1514_v23 }
 0x447   :  { %634 = vmatpush.msrb.mxu0 %v1518_v32 }
 0x448   :  { %v504_v35 = vrot.slane %v503_v33, 4 }
 0x449   :  { %635 = vmatpush.msrb.mxu0 %v1519_v31  ;;  %v543_v36 = vpop.permute.xlu2 %542  ;;  %v1532_v19 = vpop.permute.xlu1 %1531 }
 0x44a   :  { %v505_v38 = vadd.f32 %v504_v35, %v503_v33  ;;  %566 = vmatpush.msrb.mxu2 %v543_v36  ;;  %v1533_v21 = vunpack.i.l.bf16 %v1532_v19  ;;  %v1534_v22 = vunpack.i.h.bf16 %v1532_v19 }
 0x44b   :  { %1397 = vmatmul.msk.f32.gmra.mxu3 %vm164_vm1, %v1833_v14  ;;  %636 = vmatpush.msrb.mxu0 %v1523_v34 }
 0x44c   :  { %v506_v39 = vrot.slane %v505_v38, 2  ;;  %v658_v49 = vpop.permute.xlu0 %657 }
 0x44d   :  { %1400 = vmatmul.msk.f32.vlgmr.msrb.gmra.mxu1 %vm56_vm0, %v1725_v7  ;;  %637 = vmatpush.msrb.mxu0 %v1524_v11 }
 0x44e   :  { %v507_v41 = vadd.f32 %v506_v39, %v505_v38  ;;  %1398 = vmatmul.msk.f32.vlgmr.msrb.gmra.mxu0 %vm56_vm0, %v1725_v7 }
 0x450   :  { %v508_v42 = vrot.slane %v507_v41, 1 }
 0x451   :  { %v1542_v29 = vpop.permute.xlu1 %1541 }
 0x452   :  { %v509_v45 = vadd.f32 %v508_v42, %v507_v41  ;;  %v1543_v34 = vunpack.i.l.bf16 %v1542_v29  ;;  %v1544_v35 = vunpack.i.h.bf16 %v1542_v29 }
 0x454   :  { %v1883_v46 = vadd.f32 %v509_v45, %v263_v43  ;;  %v1527_v61 = vpop.permute.xlu0 %1526 }
 0x455   :  { %1401 = vmatmul.msk.f32.gmra.mxu1 %vm56_vm0, %v1720_v6  ;;  %v1529_v62 = vunpack.i.h.bf16 %v1527_v61  ;;  %v1528_v63 = vunpack.i.l.bf16 %v1527_v61 }
 0x456   :  { %1399 = vmatmul.msk.f32.gmra.mxu0 %vm56_vm0, %v1720_v6 }
 0x457   :  { %710 = vmatpush.msra.mxu2 %v1528_v63 }
 0x459   :  { %711 = vmatpush.msra.mxu2 %v1529_v62 }
 0x45b   :  { %712 = vmatpush.msra.mxu2 %v1533_v21 }
 0x45d   :  { %713 = vmatpush.msra.mxu2 %v1534_v22 }
 0x4ba   :  { %v534_v14 = vpop.f32.mrf.mxu1 }
 0x4bb   :  { %1394 = vmatmul.msk.f32.vlgmr.msrb.gmra.mxu2 %vm164_vm1, %v534_v14 }
 0x4c2   :  { %v537_v47 = vpop.f32.mrf.mxu1 }
 0x4c3   :  { %1395 = vmatmul.msk.f32.gmra.mxu2 %vm164_vm1, %v537_v47 }
 0x4c6   :  { %v1898_v60 = vpop.f32.mrf.mxu3 }
 0x4ca   :  { %v677_v48 = vpop.f32.mrf.mxu1 }
 0x4cb   :  { %v639_v52 = vpop.f32.mrf.mxu0  ;;  %v678_v53 = vadd.f32 %v677_v48, %v658_v49  ;;  %1402 = vmatmul.msk.f32.vlgmr.msra.gmra.mxu2 %vm56_vm0, %v1725_v7 }
 0x4cc   :  { %v640_v54 = vadd.f32 %v639_v52, %v620_v4 }
 0x4ce   :  { %v1900_v1 = vpop.f32.mrf.mxu3 }
 0x4d2   :  { %v680_v51 = vpop.f32.mrf.mxu1 }
 0x4d3   :  { %v681_v3 = vadd.f32 %v680_v51, %v658_v49  ;;  %v642_v56 = vpop.f32.mrf.mxu0  ;;  %1403 = vmatmul.msk.f32.gmra.mxu2 %vm56_vm0, %v1720_v6 }
 0x4d4   :  { %v643_v58 = vadd.f32 %v642_v56, %v620_v4 }
 0x4d5   :  { %1404 = vmatpush.xpose.msk.msra.mxu3 %vm164_vm1, %v681_v3 }
 0x4d9   :  { %1405 = vmatpush.xpose.msk.msra.mxu3 %vm164_vm1, %v678_v53 }
 0x4dc   :  { %1406 = vmatmul.msk.f32.vlgmr.msra.gmra.mxu3 %vm164_vm1, %v640_v54 }
 0x4e4   :  { %1407 = vmatmul.msk.f32.gmra.mxu3 %vm164_vm1, %v643_v58 }
 0x53e   :  { %v1933_v41 = vpop.f32.mrf.mxu2 }
 0x55f   :  { %v750_v8 = vpop.f32.mrf.mxu3 }
 0x560   :  { %v756_v9 = vmul.f32 0.35355338, %v750_v8 }
 0x562   :  { %v758_v10 = vadd.f32 %v756_v9, %v1782_v50 }
 0x564   :  { %v760_v12 = vsel %vm204_vm3, %v758_v10, -inf }
 0x565   :  { %761 = vmax.xlane.f32.xlu2 %v760_v12 }
 0x567   :  { %v753_v13 = vpop.f32.mrf.mxu3 }
 0x568   :  { %v757_v16 = vmul.f32 0.35355338, %v753_v13 }
 0x56a   :  { %v759_v17 = vadd.f32 %v757_v16, %v1796_v57 }
 0x56c   :  { %v763_v18 = vsel %vm204_vm3, %v759_v17, -inf }
 0x56d   :  { %764 = vmax.xlane.f32.xlu0 %v763_v18 }
 0x57d   :  { %1536 = vrot.lane.b32.xlu2 %v1693_v2, %s1635_s14 }
 0x585   :  { %1546 = vrot.lane.b32.xlu2 %v1693_v2, %s1636_s15 }
 0x58d   :  { %935 = vrot.lane.b32.xlu2 %v1752_v20, %s1636_s15 }
 0x5d8   :  { %v762_v23 = vpop.xlane.xlu2 %761 }
 0x5d9   :  { %v766_v25 = vsub.f32 %v758_v10, %v762_v23 }
 0x5db   :  { %v768_v26 = vmul.f32 1.442695, %v766_v25 }
 0x5dd   :  { %1592 = vpow2.f32 %v768_v26 }
 0x5e0   :  { %v765_v27 = vpop.xlane.xlu0 %764  ;;  %v1537_v28 = vpop.permute.xlu2 %1536 }
 0x5e1   :  { %v767_v2 = vsub.f32 %v759_v17, %v765_v27  ;;  %v1539_v31 = vunpack.i.h.bf16 %v1537_v28  ;;  %v1538_v32 = vunpack.i.l.bf16 %v1537_v28 }
 0x5e3   :  { %v1593_v20 = vpop.eup %1592  ;;  %v770_v30 = vmul.f32 1.442695, %v767_v2  ;;  %950 = vmatpush.msrb.mxu3 %v1538_v32 }
 0x5e4   :  { %v772_v59 = vsel %vm1776_vm2, %v1593_v20, 0.0 }
 0x5e5   :  { %1594 = vpow2.f32 %v770_v30  ;;  %v774_v33 = vsel %vm204_vm3, %v772_v59, 0.0  ;;  %951 = vmatpush.msrb.mxu3 %v1539_v31 }
 0x5e6   :  { %775 = vadd.xlane.f32.xlu1 %v774_v33 }
 0x5e7   :  { %952 = vmatpush.msrb.mxu3 %v1543_v34 }
 0x5e8   :  { %v1547_v38 = vpop.permute.xlu2 %1546 }
 0x5e9   :  { %953 = vmatpush.msrb.mxu3 %v1544_v35  ;;  %v1548_v39 = vunpack.i.l.bf16 %v1547_v38  ;;  %v1549_v40 = vunpack.i.h.bf16 %v1547_v38 }
 0x5ea   :  { %1414 = vmatmul.msk.f32.vlgmr.msrb.gmra.mxu3 %vm56_vm0, %v1725_v7 }
 0x5eb   :  { %v1595_v11 = vpop.eup %1594  ;;  %912 = vmatpush.msrb.mxu2 %v1548_v39 }
 0x5ec   :  { %v773_v36 = vsel %vm1790_vm4, %v1595_v11, 0.0 }
 0x5ed   :  { %v777_v37 = vsel %vm204_vm3, %v773_v36, 0.0  ;;  %913 = vmatpush.msrb.mxu2 %v1549_v40 }
 0x5ee   :  { %778 = vadd.xlane.f32.xlu0 %v777_v37  ;;  %v1956_v37 = vld [vmem:[%s2104_s3 + $0x18] sm:$0xff] }
 0x5f0   :  { %v936_v28 = vpop.permute.xlu2 %935 }
 0x5f2   :  { %1415 = vmatmul.msk.f32.gmra.mxu3 %vm56_vm0, %v1720_v6 }
 0x5ff   :  { %1551 = vrot.lane.b32.xlu1 %v1712_v5, %s1636_s15  ;;  %v1935_v5 = vpop.f32.mrf.mxu2 }
 0x602   :  { %695 = vrot.lane.b32.xlu0 %v1810_v15, %s1631_s10 }
 0x607   :  { %897 = vrot.lane.b32.xlu1 %v1758_v24, %s1636_s15  ;;  %v715_v51 = vpop.f32.mrf.mxu2 }
 0x60a   :  { %851 = vrot.lane.b32.xlu0 %v1687_v0, %s1633_s12 }
 0x60f   :  { %v718_v16 = vpop.f32.mrf.mxu2 }
 0x659   :  { %v776_v42 = vpop.xlane.xlu1 %775 }
 0x65a   :  { %1596 = vrcp.f32 %v776_v42  ;;  %v791_v49 = vand.u32 2147483648, %v776_v42  ;;  %vm785_vm11 = vweird.f32 %v776_v42  ;;  %v789_v3 = vand.u32 2147483647, %v776_v42 }
 0x65c   :  { %v792_v54 = vor.u32 1.1754944e-38, %v791_v49  ;;  %vm790_vm13 = vcmp.eq.f32.partialorder %v789_v3, 8.507059e+37 }
 0x660   :  { %v1597_v43 = vpop.eup %1596 }
 0x661   :  { %v781_v45 = vmul.f32 %v1597_v43, %v776_v42  ;;  %v779_v14 = vpop.xlane.xlu0 %778  ;;  %vm786_vm10 = vweird.f32 %v1597_v43 }
 0x662   :  { %1598 = vrcp.f32 %v779_v14  ;;  %vm787_vm12 = vmor %vm785_vm11, %vm786_vm10  ;;  %v806_v56 = vand.u32 2147483648, %v779_v14  ;;  %v804_v61 = vand.u32 2147483647, %v779_v14  ;;  %vm800_vm15 = vweird.f32 %v779_v14 }
 0x663   :  { %v782_v47 = vsub.f32 1.0, %v781_v45 }
 0x664   :  { %v807_v9 = vor.u32 1.1754944e-38, %v806_v56  ;;  %vm805_vm6 = vcmp.eq.f32.partialorder %v804_v61, 8.507059e+37 }
 0x665   :  { %v783_v24 = vmul.f32 %v1597_v43, %v782_v47  ;;  %v1621_v47 = vld [vmem:[%s2104_s3 + $0x8] sm:$0xff] }
 0x667   :  { %v784_v48 = vadd.f32 %v1597_v43, %v783_v24 }
 0x668   :  { %v1599_v0 = vpop.eup %1598 }
 0x669   :  { %v796_v52 = vmul.f32 %v1599_v0, %v779_v14  ;;  %v788_v4 = vsel %vm787_vm12, %v1597_v43, %v784_v48  ;;  %vm801_vm14 = vweird.f32 %v1599_v0  ;;  %v1620_v14 = vld [vmem:[%s2104_s3] sm:$0xff] }
 0x66a   :  { %v793_v62 = vsel %vm790_vm13, %v792_v54, %v788_v4  ;;  %vm802_vm5 = vmor %vm800_vm15, %vm801_vm14  ;;  %v1560_v24 = vpack.i.bf16 %v1620_v14, %v1621_v47  ;;  %v605_v4 = vadd.f32 %v1900_v1, %v1935_v5  ;;  %vm1360_vm13 = vcmask 122880  }
 0x66b   :  { %v797_v53 = vsub.f32 1.0, %v796_v52  ;;  %v794_v10 = vmul.f32 %v793_v62, %v772_v59 }
 0x66c   :  { %1561 = vrot.lane.b32.xlu2 %v1560_v24, %s1637_s20 }
 0x66d   :  { %v798_v58 = vmul.f32 %v1599_v0, %v797_v53  ;;  %v955_v8 = vpop.f32.mrf.mxu3  ;;  %v810_v25 = vsel %vm204_vm3, %v794_v10, 0.0 }
 0x66e   :  { %v956_v34 = vadd.f32 %v955_v8, %v936_v28 }
 0x66f   :  { %v799_v63 = vadd.f32 %v1599_v0, %v798_v58 }
 0x671   :  { %v1552_v12 = vpop.permute.xlu1 %1551  ;;  %v803_v13 = vsel %vm802_vm5, %v1599_v0, %v799_v63  ;;  %v602_v0 = vadd.f32 %v1898_v60, %v1933_v41 }
 0x672   :  { %v1554_v17 = vunpack.i.h.bf16 %v1552_v12  ;;  %v1553_v18 = vunpack.i.l.bf16 %v1552_v12  ;;  %v808_v19 = vsel %vm805_vm6, %v807_v9, %v803_v13 }
 0x673   :  { %v809_v21 = vmul.f32 %v808_v19, %v773_v36  ;;  %v1618_v36 = vld [vmem:[%s2104_s3 + $0x10] sm:$0xff] }
 0x674   :  { %v696_v22 = vpop.permute.xlu0 %695  ;;  %914 = vmatpush.msrb.mxu2 %v1553_v18 }
 0x675   :  { %v719_v23 = vadd.f32 %v718_v16, %v696_v22  ;;  %v811_v26 = vsel %vm204_vm3, %v809_v21, 0.0  ;;  %v716_v2 = vadd.f32 %v715_v51, %v696_v22  ;;  %v958_v29 = vpop.f32.mrf.mxu3 }
 0x676   :  { %915 = vmatpush.msrb.mxu2 %v1554_v17  ;;  %v812_v27 = vadd.f32 %v811_v26, %v810_v25  ;;  %v959_v31 = vadd.f32 %v958_v29, %v936_v28 }
 0x677   :  { %840 = vmatpush.msra.mxu0 %v719_v23  ;;  %1412 = vmatmul.msk.f32.vlgmr.msrb.gmra.mxu2 %vm56_vm0, %v1725_v7 }
 0x678   :  { %v813_v20 = vrot.slane %v812_v27, 4 }
 0x679   :  { %841 = vmatpush.msra.mxu0 %v716_v2 }
 0x67a   :  { %1408 = vmatmul.msk.f32.vlgmr.msra.gmra.mxu0 %vm204_vm3, %v794_v10  ;;  %v814_v30 = vadd.f32 %v813_v20, %v812_v27 }
 0x67c   :  { %v815_v32 = vrot.slane %v814_v30, 2  ;;  %v852_v59 = vpop.permute.xlu0 %851 }
 0x67d   :  { %875 = vmatpush.msra.mxu1 %v852_v59 }
 0x67e   :  { %v816_v33 = vadd.f32 %v815_v32, %v814_v30 }
 0x67f   :  { %1418 = vmatpush.xpose.msk.msrb.mxu1 %vm164_vm1, %v959_v31  ;;  %1413 = vmatmul.msk.f32.gmra.mxu2 %vm56_vm0, %v1720_v6  ;;  %v1555_v6 = vpack.i.bf16 %v1618_v36, %v1956_v37 }
 0x680   :  { %v817_v35 = vrot.slane %v816_v33, 1 }
 0x681   :  { %1556 = vrot.lane.b32.xlu0 %v1555_v6, %s1637_s20 }
 0x682   :  { %v818_v7 = vadd.f32 %v817_v35, %v816_v33  ;;  %1409 = vmatmul.msk.f32.gmra.mxu0 %vm204_vm3, %v809_v21 }
 0x683   :  { %1419 = vmatpush.xpose.msk.msrb.mxu1 %vm164_vm1, %v956_v34 }
 0x684   :  { %v1948_v11 = vadd.f32 %v818_v7, %v1883_v46  ;;  %v898_v46 = vpop.permute.xlu1 %897 }
 0x6c6   :  { %v1562_v1 = vpop.permute.xlu2 %1561 }
 0x6c7   :  { %v1564_v5 = vunpack.i.h.bf16 %v1562_v1  ;;  %v1563_v9 = vunpack.i.l.bf16 %v1562_v1 }
 0x6f3   :  { %v1557_v48 = vpop.permute.xlu0 %1556 }
 0x6f4   :  { %v1559_v49 = vunpack.i.h.bf16 %v1557_v48  ;;  %v1558_v51 = vunpack.i.l.bf16 %v1557_v48 }
 0x6f6   :  { %988 = vmatpush.msrb.mxu0 %v1558_v51 }
 0x6f7   :  { %v843_v38 = vpop.f32.mrf.mxu0 }
 0x6f8   :  { %1410 = vmatmul.msk.f32.vlgmr.msra.gmra.mxu1 %vm164_vm1, %v843_v38  ;;  %989 = vmatpush.msrb.mxu0 %v1559_v49 }
 0x6fa   :  { %v917_v40 = vpop.f32.mrf.mxu2  ;;  %990 = vmatpush.msrb.mxu0 %v1563_v9 }
 0x6fb   :  { %v918_v42 = vadd.f32 %v917_v40, %v898_v46 }
 0x6fc   :  { %991 = vmatpush.msrb.mxu0 %v1564_v5 }
 0x6ff   :  { %v846_v39 = vpop.f32.mrf.mxu0 }
 0x700   :  { %1411 = vmatmul.msk.f32.gmra.mxu1 %vm164_vm1, %v846_v39 }
 0x702   :  { %v920_v43 = vpop.f32.mrf.mxu2 }
 0x703   :  { %v921_v45 = vadd.f32 %v920_v43, %v898_v46 }
 0x708   :  { %1420 = vmatmul.msk.f32.vlgmr.msrb.gmra.mxu1 %vm164_vm1, %v918_v42 }
 0x710   :  { %1421 = vmatmul.msk.f32.gmra.mxu1 %vm164_vm1, %v921_v45 }
 0x775   :  { %v877_v3 = vpop.f32.mrf.mxu1 }
 0x776   :  { %v1971_v52 = vadd.f32 %v877_v3, %v602_v0 }
 0x77d   :  { %v880_v53 = vpop.f32.mrf.mxu1 }
 0x77e   :  { %v1975_v54 = vadd.f32 %v880_v53, %v605_v4 }
 0x785   :  { %v1028_v56 = vpop.f32.mrf.mxu1 }
 0x786   :  { %v1034_v58 = vmul.f32 0.35355338, %v1028_v56 }
 0x788   :  { %v1036_v61 = vadd.f32 %v1034_v58, %v1782_v50  ;;  %v1986_v50 = vld [vmem:[%s2106_s0] sm:$0xff] }
 0x789   :  { %1416 = vmatmul.msk.f32.vlgmr.msrb.gmra.mxu0 %vm56_vm0, %v1986_v50 }
 0x78a   :  { %v1038_v60 = vsel %vm204_vm3, %v1036_v61, -inf }
 0x78b   :  { %1039 = vmax.xlane.f32.xlu1 %v1038_v60 }
 0x78d   :  { %v1031_v41 = vpop.f32.mrf.mxu1 }
 0x78e   :  { %v1035_v62 = vmul.f32 0.35355338, %v1031_v41 }
 0x790   :  { %v1037_v63 = vadd.f32 %v1035_v62, %v1796_v57  ;;  %v1993_v57 = vld [vmem:[%s2106_s0 + $0x8] sm:$0xff] }
 0x791   :  { %1417 = vmatmul.msk.f32.gmra.mxu0 %vm56_vm0, %v1993_v57 }
 0x792   :  { %v1041_v8 = vsel %vm204_vm3, %v1037_v63, -inf }
 0x793   :  { %1042 = vmax.xlane.f32.xlu0 %v1041_v8  ;;  %v1569_v8 = vld [vmem:[%s2105_s6 + $0x3] ss:$0 sm:$0xff] }
 0x7a7   :  { %973 = vrot.lane.b32.xlu0 %v1810_v15, %s1636_s15 }
 0x7fe   :  { %v1040_v15 = vpop.xlane.xlu1 %1039 }
 0x7ff   :  { %v1044_v10 = vsub.f32 %v1036_v61, %v1040_v15 }
 0x801   :  { %v1046_v12 = vmul.f32 1.442695, %v1044_v10 }
 0x803   :  { %1600 = vpow2.f32 %v1046_v12 }
 0x806   :  { %v1043_v13 = vpop.xlane.xlu0 %1042  ;;  %v993_v26 = vpop.f32.mrf.mxu0 }
 0x807   :  { %v1045_v16 = vsub.f32 %v1037_v63, %v1043_v13 }
 0x809   :  { %v1601_v17 = vpop.eup %1600  ;;  %v1048_v18 = vmul.f32 1.442695, %v1045_v16 }
 0x80a   :  { %v1050_v19 = vsel %vm1776_vm2, %v1601_v17, 0.0 }
 0x80b   :  { %1602 = vpow2.f32 %v1048_v18  ;;  %v1052_v21 = vsel %vm204_vm3, %v1050_v19, 0.0  ;;  %v1638_v18 = vmov 32.0  }
 0x80c   :  { %1053 = vadd.xlane.f32.xlu2 %v1052_v21 }
 0x80e   :  { %v996_v2 = vpop.f32.mrf.mxu0 }
 0x811   :  { %v1603_v22 = vpop.eup %1602 }
 0x812   :  { %v1051_v23 = vsel %vm1790_vm4, %v1603_v22, 0.0 }
 0x813   :  { %v1055_v25 = vsel %vm204_vm3, %v1051_v23, 0.0 }
 0x814   :  { %1056 = vadd.xlane.f32.xlu1 %v1055_v25 }
 0x819   :  { %v974_v27 = vpop.permute.xlu0 %973 }
 0x81a   :  { %v997_v28 = vadd.f32 %v996_v2, %v974_v27  ;;  %v994_v44 = vadd.f32 %v993_v26, %v974_v27 }
 0x81c   :  { %1118 = vmatpush.msra.mxu2 %v997_v28 }
 0x81e   :  { %1119 = vmatpush.msra.mxu2 %v994_v44 }
 0x824   :  { %1127 = vrot.lane.b32.xlu2 %v1956_v37, %s1633_s12 }
 0x87f   :  { %v1054_v29 = vpop.xlane.xlu2 %1053 }
 0x880   :  { %1604 = vrcp.f32 %v1054_v29  ;;  %v1069_v32 = vand.u32 2147483648, %v1054_v29  ;;  %v1067_v33 = vand.u32 2147483647, %v1054_v29  ;;  %vm1063_vm4 = vweird.f32 %v1054_v29 }
 0x882   :  { %v1070_v7 = vor.u32 1.1754944e-38, %v1069_v32  ;;  %vm1068_vm8 = vcmp.eq.f32.partialorder %v1067_v33, 8.507059e+37  ;;  %v1226_v32 = vld [vmem:[%s2110_s4] sm:$0xff] }
 0x886   :  { %v1605_v20 = vpop.eup %1604 }
 0x887   :  { %v1059_v30 = vmul.f32 %v1605_v20, %v1054_v29  ;;  %v1057_v31 = vpop.xlane.xlu1 %1056  ;;  %vm1064_vm2 = vweird.f32 %v1605_v20  ;;  %v1128_v36 = vpop.permute.xlu2 %1127 }
 0x888   :  { %1606 = vrcp.f32 %v1057_v31  ;;  %vm1065_vm7 = vmor %vm1063_vm4, %vm1064_vm2  ;;  %1151 = vmatpush.msra.mxu3 %v1128_v36  ;;  %v1084_v40 = vand.u32 2147483648, %v1057_v31  ;;  %v1082_v43 = vand.u32 2147483647, %v1057_v31  ;;  %vm1078_vm10 = vweird.f32 %v1057_v31  ;;  %v1268_v36 = vld [vmem:[%s2111_s5 + $0x28] sm:$0xff] }
 0x889   :  { %v1060_v55 = vsub.f32 1.0, %v1059_v30  ;;  %1608 = vrcp.f32 %v1638_v18  ;;  %v1229_v30 = vld [vmem:[%s2110_s4 + $0x18] sm:$0xff]  ;;  %vm1273_vm4 = vcmask 523264   ;;  %v1573_v18 = vld [vmem:[%s2105_s6 + $0x5] ss:$0 sm:$0xff] }
 0x88a   :  { %v1085_v14 = vor.u32 1.1754944e-38, %v1084_v40  ;;  %vm1083_vm12 = vcmp.eq.f32.partialorder %v1082_v43, 8.507059e+37  ;;  %1250 = vmatpush.msra.mxu0 %v1229_v30  ;;  %v1266_v40 = vld [vmem:[%s2111_s5 + $0x18] sm:$0xff] }
 0x88b   :  { %v1061_v59 = vmul.f32 %v1605_v20, %v1060_v55  ;;  %v1227_v55 = vld [vmem:[%s2110_s4 + $0x8] sm:$0xff] }
 0x88d   :  { %v1062_v34 = vadd.f32 %v1605_v20, %v1061_v59 }
 0x88e   :  { %v1607_v35 = vpop.eup %1606 }
 0x88f   :  { %v1066_v37 = vsel %vm1065_vm7, %v1605_v20, %v1062_v34  ;;  %v1074_v6 = vmul.f32 %v1607_v35, %v1057_v31  ;;  %vm1079_vm9 = vweird.f32 %v1607_v35  ;;  %v1228_v31 = vld [vmem:[%s2110_s4 + $0x10] sm:$0xff] }
 0x890   :  { %v1071_v38 = vsel %vm1068_vm8, %v1070_v7, %v1066_v37  ;;  %vm1080_vm11 = vmor %vm1078_vm10, %vm1079_vm9  ;;  %1251 = vmatpush.msra.mxu0 %v1228_v31  ;;  %v1269_v7 = vld [vmem:[%s2111_s5 + $0x30] sm:$0xff] }
 0x891   :  { %v1075_v39 = vsub.f32 1.0, %v1074_v6  ;;  %v1072_v46 = vmul.f32 %v1071_v38, %v1050_v19  ;;  %v1609_v19 = vpop.eup %1608  ;;  %v1267_v38 = vld [vmem:[%s2111_s5 + $0x20] sm:$0xff] }
 0x892   :  { %v1176_v21 = vmul.f32 32.0, %v1609_v19  ;;  %1252 = vmatpush.msra.mxu0 %v1227_v55 }
 0x893   :  { %v1076_v42 = vmul.f32 %v1607_v35, %v1075_v39  ;;  %1422 = vmatmul.msk.f32.vlgmr.msra.gmra.mxu2 %vm204_vm3, %v1072_v46  ;;  %v1088_v0 = vsel %vm204_vm3, %v1072_v46, 0.0 }
 0x894   :  { %1253 = vmatpush.msra.mxu0 %v1226_v32 }
 0x895   :  { %v1077_v45 = vadd.f32 %v1607_v35, %v1076_v42 }
 0x897   :  { %v1081_v47 = vsel %vm1080_vm11, %v1607_v35, %v1077_v45  ;;  %v1270_v35 = vld [vmem:[%s2111_s5 + $0x38] sm:$0xff] }
 0x898   :  { %v1086_v24 = vsel %vm1083_vm12, %v1085_v14, %v1081_v47  ;;  %1288 = vmatpush.msra.mxu1 %v1270_v35 }
 0x899   :  { %v1087_v48 = vmul.f32 %v1086_v24, %v1051_v23 }
 0x89a   :  { %1289 = vmatpush.msra.mxu1 %v1269_v7 }
 0x89b   :  { %v1089_v49 = vsel %vm204_vm3, %v1087_v48, 0.0  ;;  %1423 = vmatmul.msk.f32.gmra.mxu2 %vm204_vm3, %v1087_v48 }
 0x89c   :  { %v1090_v51 = vadd.f32 %v1089_v49, %v1088_v0  ;;  %1290 = vmatpush.msra.mxu1 %v1268_v36  ;;  %v1570_v0 = vld [vmem:[%s2105_s6 + $0x6] ss:$0 sm:$0xff] }
 0x89e   :  { %v1091_v3 = vrot.slane %v1090_v51, 4  ;;  %1291 = vmatpush.msra.mxu1 %v1267_v38 }
 0x8a0   :  { %v1092_v4 = vadd.f32 %v1091_v3, %v1090_v51  ;;  %1292 = vmatpush.msra.mxu1 %v1266_v40 }
 0x8a2   :  { %v1093_v53 = vrot.slane %v1092_v4, 2 }
 0x8a4   :  { %v1094_v56 = vadd.f32 %v1093_v53, %v1092_v4  ;;  %v1571_v4 = vld [vmem:[%s2105_s6 + $0x7] ss:$0 sm:$0xff] }
 0x8a6   :  { %v1095_v58 = vrot.slane %v1094_v56, 1 }
 0x8a8   :  { %v1096_v61 = vadd.f32 %v1095_v58, %v1094_v56 }
 0x8aa   :  { %v1097_v60 = vadd.f32 %v1096_v61, %v1948_v11 }
 0x8ac   :  { %v1359_v41 = vmul.f32 0.25, %v1097_v60 }
 0x8ae   :  { %1361 = vst.msk [vmem:[%s2109_s8] sm:$0x1] %vm1360_vm13, %v1359_v41 }
 0x916   :  { %v1121_v62 = vpop.f32.mrf.mxu2 }
 0x917   :  { %1424 = vmatmul.msk.f32.vlgmr.msra.gmra.mxu3 %vm164_vm1, %v1121_v62 }
 0x91e   :  { %v1124_v63 = vpop.f32.mrf.mxu2 }
 0x91f   :  { %1425 = vmatmul.msk.f32.gmra.mxu3 %vm164_vm1, %v1124_v63  ;;  %vm1180_vm1 = vweird.f32 %v1609_v19 }
 0x99a   :  { %v1153_v1 = vpop.f32.mrf.mxu3 }
 0x99b   :  { %v1159_v5 = vadd.f32 %v1153_v1, %v1971_v52  ;;  %v1177_v52 = vsub.f32 1.0, %v1176_v21  ;;  %v1265_v1 = vld [vmem:[%s2111_s5 + $0x10] sm:$0xff] }
 0x99c   :  { %1293 = vmatpush.msra.mxu1 %v1265_v1 }
 0x99d   :  { %v1163_v11 = vadd.f32 %v1569_v8, %v1159_v5  ;;  %v1178_v22 = vmul.f32 %v1609_v19, %v1177_v52  ;;  %v1264_v5 = vld [vmem:[%s2111_s5 + $0x8] sm:$0xff] }
 0x99e   :  { %1294 = vmatpush.msra.mxu1 %v1264_v5 }
 0x99f   :  { %v1165_v9 = vadd.f32 %v1986_v50, %v1163_v11  ;;  %v1179_v23 = vadd.f32 %v1609_v19, %v1178_v22  ;;  %v1263_v11 = vld [vmem:[%s2111_s5] sm:$0xff] }
 0x9a0   :  { %1295 = vmatpush.msra.mxu1 %v1263_v11 }
 0x9a1   :  { %v1169_v15 = vsel %vm56_vm0, %v1165_v9, 0.0  ;;  %v2024_v50 = vsel %vm1180_vm1, %v1609_v19, %v1179_v23 }
 0x9a2   :  { %1170 = vadd.xlane.f32.xlu1 %v1169_v15  ;;  %v1156_v10 = vpop.f32.mrf.mxu3 }
 0x9a3   :  { %v1160_v12 = vadd.f32 %v1156_v10, %v1975_v54 }
 0x9a5   :  { %v1164_v13 = vadd.f32 %v1569_v8, %v1160_v12 }
 0x9a7   :  { %v1166_v16 = vadd.f32 %v1993_v57, %v1164_v13 }
 0x9a9   :  { %v1172_v17 = vsel %vm56_vm0, %v1166_v16, 0.0 }
 0x9aa   :  { %1173 = vadd.xlane.f32.xlu1 %v1172_v17 }
 0xa15   :  { %v1171_v25 = vpop.xlane.xlu1 %1170 }
 0xa16   :  { %v1182_v26 = vmul.f32 %v2024_v50, %v1171_v25 }
 0xa18   :  { %v1184_v54 = vsub.f32 %v1165_v9, %v1182_v26  ;;  %v1572_v9 = vld [vmem:[%s2105_s6 + $0x4] ss:$0 sm:$0xff] }
 0xa1a   :  { %v1186_v27 = vmul.f32 %v1184_v54, %v1184_v54 }
 0xa1c   :  { %v1188_v57 = vsel %vm56_vm0, %v1186_v27, 0.0 }
 0xa1d   :  { %1189 = vadd.xlane.f32.xlu0 %v1188_v57  ;;  %v1174_v2 = vpop.xlane.xlu1 %1173 }
 0xa1e   :  { %v1183_v28 = vmul.f32 %v2024_v50, %v1174_v2 }
 0xa20   :  { %v1185_v44 = vsub.f32 %v1166_v16, %v1183_v28 }
 0xa22   :  { %v1187_v29 = vmul.f32 %v1185_v44, %v1185_v44 }
 0xa24   :  { %v1191_v20 = vsel %vm56_vm0, %v1187_v29, 0.0 }
 0xa25   :  { %1192 = vadd.xlane.f32.xlu1 %v1191_v20 }
 0xa90   :  { %v1190_v59 = vpop.xlane.xlu0 %1189 }
 0xa91   :  { %v1194_v33 = vmul.f32 %v1190_v59, %v2024_v50 }
 0xa93   :  { %v1196_v34 = vadd.f32 1e-05, %v1194_v33 }
 0xa95   :  { %1610 = vrsqrt.f32 %v1196_v34  ;;  %vm1204_vm14 = vweird.f32 %v1196_v34 }
 0xa98   :  { %v1193_v37 = vpop.xlane.xlu1 %1192 }
 0xa99   :  { %v1195_v6 = vmul.f32 %v1193_v37, %v2024_v50 }
 0xa9b   :  { %v1611_v39 = vpop.eup %1610  ;;  %v1197_v46 = vadd.f32 1e-05, %v1195_v6 }
 0xa9c   :  { %v1199_v42 = vmul.f32 %v1611_v39, %v1196_v34  ;;  %vm1205_vm3 = vweird.f32 %v1611_v39 }
 0xa9d   :  { %1612 = vrsqrt.f32 %v1197_v46  ;;  %vm1206_vm15 = vmor %vm1204_vm14, %vm1205_vm3  ;;  %vm1214_vm6 = vweird.f32 %v1197_v46 }
 0xa9e   :  { %v1200_v43 = vmul.f32 %v1611_v39, %v1199_v42 }
 0xaa0   :  { %v1201_v45 = vmul.f32 0.5, %v1200_v43  ;;  %v1574_v43 = vld [vmem:[%s2105_s6 + $0x8] ss:$0 sm:$0xff] }
 0xaa2   :  { %v1202_v14 = vsub.f32 1.5, %v1201_v45 }
 0xaa3   :  { %v1613_v47 = vpop.eup %1612 }
 0xaa4   :  { %v1203_v24 = vmul.f32 %v1611_v39, %v1202_v14  ;;  %v1209_v48 = vmul.f32 %v1613_v47, %v1197_v46  ;;  %vm1215_vm5 = vweird.f32 %v1613_v47 }
 0xaa5   :  { %vm1216_vm2 = vmor %vm1214_vm6, %vm1215_vm5 }
 0xaa6   :  { %v1207_v49 = vsel %vm1206_vm15, %v1611_v39, %v1203_v24  ;;  %v1210_v51 = vmul.f32 %v1613_v47, %v1209_v48 }
 0xaa7   :  { %v1218_v3 = vmul.f32 %v1207_v49, %v1184_v54 }
 0xaa8   :  { %v1211_v53 = vmul.f32 0.5, %v1210_v51 }
 0xaa9   :  { %v1221_v56 = vmul.f32 %v1570_v0, %v1218_v3 }
 0xaaa   :  { %v1212_v58 = vsub.f32 1.5, %v1211_v53 }
 0xaab   :  { %v1224_v61 = vadd.f32 %v1571_v4, %v1221_v56 }
 0xaac   :  { %v1213_v60 = vmul.f32 %v1613_v47, %v1212_v58 }
 0xaad   :  { %1426 = vmatmul.msk.f32.vlgmr.msra.gmra.mxu0 %vm56_vm0, %v1224_v61 }
 0xaae   :  { %v1217_v41 = vsel %vm1216_vm2, %v1613_v47, %v1213_v60 }
 0xaaf   :  { %v1219_v62 = vmul.f32 %v1217_v41, %v1185_v44 }
 0xab1   :  { %v1222_v63 = vmul.f32 %v1570_v0, %v1219_v62 }
 0xab3   :  { %v1225_v8 = vadd.f32 %v1571_v4, %v1222_v63 }
 0xab5   :  { %1427 = vmatmul.msk.f32.gmra.mxu0 %vm56_vm0, %v1225_v8 }
 0xb2a   :  { %v1255_v15 = vpop.f32.mrf.mxu0 }
 0xb2b   :  { %v1256_v10 = vadd.f32 %v1572_v9, %v1255_v15 }
 0xb2d   :  { %v1261_v12 = vmax.f32 %v1256_v10, 0.0 }
 0xb2f   :  { %1428 = vmatmul.msk.f32.vlgmr.msra.gmra.mxu1 %vm1273_vm4, %v1261_v12 }
 0xb32   :  { %v1258_v13 = vpop.f32.mrf.mxu0 }
 0xb33   :  { %v1259_v16 = vadd.f32 %v1572_v9, %v1258_v13 }
 0xb35   :  { %v1262_v17 = vmax.f32 %v1259_v16, 0.0 }
 0xb37   :  { %1429 = vmatmul.msk.f32.gmra.mxu1 %vm1273_vm4, %v1262_v17 }
 0xbac   :  { %v1297_v19 = vpop.f32.mrf.mxu1 }
 0xbad   :  { %v1298_v21 = vadd.f32 %v1573_v18, %v1297_v19 }
 0xbaf   :  { %v1303_v52 = vadd.f32 %v1298_v21, %v1224_v61 }
 0xbb1   :  { %v1307_v22 = vsel %vm56_vm0, %v1303_v52, 0.0 }
 0xbb2   :  { %1308 = vadd.xlane.f32.xlu2 %v1307_v22 }
 0xbb4   :  { %v1300_v23 = vpop.f32.mrf.mxu1 }
 0xbb5   :  { %v1301_v25 = vadd.f32 %v1573_v18, %v1300_v23 }
 0xbb7   :  { %v1304_v26 = vadd.f32 %v1301_v25, %v1225_v8 }
 0xbb9   :  { %v1310_v54 = vsel %vm56_vm0, %v1304_v26, 0.0 }
 0xbba   :  { %1311 = vadd.xlane.f32.xlu1 %v1310_v54 }
 0xc25   :  { %v1309_v27 = vpop.xlane.xlu2 %1308 }
 0xc26   :  { %v1313_v57 = vmul.f32 %v1309_v27, %v2024_v50 }
 0xc28   :  { %v1315_v2 = vsub.f32 %v1303_v52, %v1313_v57 }
 0xc2a   :  { %v1317_v28 = vmul.f32 %v1315_v2, %v1315_v2 }
 0xc2c   :  { %v1319_v44 = vsel %vm56_vm0, %v1317_v28, 0.0 }
 0xc2d   :  { %1320 = vadd.xlane.f32.xlu1 %v1319_v44  ;;  %v1312_v29 = vpop.xlane.xlu1 %1311 }
 0xc2e   :  { %v1314_v20 = vmul.f32 %v1312_v29, %v2024_v50 }
 0xc30   :  { %v1316_v30 = vsub.f32 %v1304_v26, %v1314_v20 }
 0xc32   :  { %v1318_v31 = vmul.f32 %v1316_v30, %v1316_v30 }
 0xc34   :  { %v1322_v55 = vsel %vm56_vm0, %v1318_v31, 0.0 }
 0xc35   :  { %1323 = vadd.xlane.f32.xlu1 %v1322_v55 }
 0xca0   :  { %v1321_v32 = vpop.xlane.xlu1 %1320 }
 0xca1   :  { %v1325_v59 = vmul.f32 %v1321_v32, %v2024_v50 }
 0xca3   :  { %v1327_v33 = vadd.f32 1e-05, %v1325_v59 }
 0xca5   :  { %1614 = vrsqrt.f32 %v1327_v33  ;;  %vm1335_vm8 = vweird.f32 %v1327_v33 }
 0xca8   :  { %v1324_v34 = vpop.xlane.xlu1 %1323 }
 0xca9   :  { %v1326_v35 = vmul.f32 %v1324_v34, %v2024_v50  ;;  %v1575_v50 = vld [vmem:[%s2105_s6 + $0x9] ss:$0 sm:$0xff] }
 0xcab   :  { %v1615_v7 = vpop.eup %1614  ;;  %v1328_v36 = vadd.f32 1e-05, %v1326_v35 }
 0xcac   :  { %v1330_v37 = vmul.f32 %v1615_v7, %v1327_v33  ;;  %vm1336_vm7 = vweird.f32 %v1615_v7 }
 0xcad   :  { %1616 = vrsqrt.f32 %v1328_v36  ;;  %vm1337_vm9 = vmor %vm1335_vm8, %vm1336_vm7  ;;  %vm1345_vm11 = vweird.f32 %v1328_v36 }
 0xcae   :  { %v1331_v6 = vmul.f32 %v1615_v7, %v1330_v37 }
 0xcb0   :  { %v1332_v38 = vmul.f32 0.5, %v1331_v6 }
 0xcb2   :  { %v1333_v39 = vsub.f32 1.5, %v1332_v38 }
 0xcb3   :  { %v1617_v46 = vpop.eup %1616 }
 0xcb4   :  { %v1334_v40 = vmul.f32 %v1615_v7, %v1333_v39  ;;  %v1340_v42 = vmul.f32 %v1617_v46, %v1328_v36  ;;  %vm1346_vm10 = vweird.f32 %v1617_v46 }
 0xcb5   :  { %vm1347_vm12 = vmor %vm1345_vm11, %vm1346_vm10 }
 0xcb6   :  { %v1338_v45 = vsel %vm1337_vm9, %v1615_v7, %v1334_v40  ;;  %v1341_v14 = vmul.f32 %v1617_v46, %v1340_v42 }
 0xcb7   :  { %v1349_v47 = vmul.f32 %v1338_v45, %v1315_v2 }
 0xcb8   :  { %v1342_v24 = vmul.f32 0.5, %v1341_v14 }
 0xcb9   :  { %v1352_v48 = vmul.f32 %v1574_v43, %v1349_v47 }
 0xcba   :  { %v1343_v0 = vsub.f32 1.5, %v1342_v24 }
 0xcbb   :  { %v1355_v49 = vadd.f32 %v1575_v50, %v1352_v48 }
 0xcbc   :  { %v1344_v51 = vmul.f32 %v1617_v46, %v1343_v0 }
 0xcbd   :  { %1357 = vst.msk [vmem:[%s2112_s7] sm:$0xff] %vm56_vm0, %v1355_v49 }
 0xcbe   :  { %v1348_v3 = vsel %vm1347_vm12, %v1617_v46, %v1344_v51 }
 0xcbf   :  { %v1350_v4 = vmul.f32 %v1348_v3, %v1316_v30 }
 0xcc1   :  { %v1353_v53 = vmul.f32 %v1574_v43, %v1350_v4 }
 0xcc3   :  { %v1356_v56 = vadd.f32 %v1575_v50, %v1353_v53 }
 0xcc5   :  { %1358 = vst.msk [vmem:[%s2112_s7 + $0x8] sm:$0xff] %vm56_vm0, %v1356_v56 }

</bundles_post_ra>
